<compile_context>
chip_gen: v5e
topology: v5e:2x2
jax: 0.10.0
libtpu: 0.0.40
codegen_flags: <defaults>
</compile_context>

<pallas_src>
import functools

import jax
import jax.numpy as jnp
from jax import lax
from jax.experimental import pallas as pl
from jax.experimental.pallas import tpu as pltpu


def _round_up(x, m):
    return (x + m - 1) // m * m


def _make_kernel(Cin, H, W, KH, KW, padding, Ho, Wo, K_pad, compute_dtype, precision):
    TM = Ho * Wo

    def kernel(x_ref, w_ref, shift_ref, o_ref, patch_ref):
        # x_ref:     (1, Cin, H, W)  input dtype, raw NCHW image (no pre-padding)
        # w_ref:     (Cout, K_pad)   compute_dtype, BN-scale folded, resident
        # shift_ref: (Cout, 1)       f32, BN shift
        # o_ref:     (1, Cout, TM)   f32, NCHW output with pixels flattened on lanes
        # patch_ref: (K_pad, TM)     f32 VMEM scratch, im2col patch matrix

        # Zero the patch matrix: every entry NOT written below is exactly the
        # conv zero-padding region (or a K->K_pad pad row).  Re-zeroed every
        # step so each megacore partition is self-contained (cheap VMEM stores).
        patch_ref[...] = jnp.zeros_like(patch_ref)

        # In-VMEM im2col straight from the unpadded NCHW image: every input row
        # is loaded once and scattered (static slices only) into the patch rows.
        # No HBM amplification, no wrapper pad/transpose/concat passes.
        # TODO(synk): for very large H*W, strip-mine Ho with an extra grid axis
        #             to bound the patch-scratch size and the unrolled op count.
        for hi in range(H):
            khs = [kh for kh in range(KH) if 0 <= hi + padding - kh < Ho]
            if not khs:
                continue
            row = x_ref[0, :, hi, :].astype(jnp.float32)          # (Cin, W)
            for kh in khs:
                h = hi + padding - kh                              # output row
                for kw in range(KW):
                    w_lo = max(0, padding - kw)
                    w_hi = min(Wo, W + padding - kw)
                    if w_lo >= w_hi:
                        continue
                    r0 = (kh * KW + kw) * Cin
                    patch_ref[r0:r0 + Cin, h * Wo + w_lo:h * Wo + w_hi] = (
                        row[:, w_lo + kw - padding:w_hi + kw - padding])

        # Single big-K matmul on the MXU (bf16 operands by default, f32 acc).
        patches = patch_ref[...].astype(compute_dtype)
        acc = lax.dot_general(
            w_ref[...], patches,
            dimension_numbers=(((1,), (0,)), ((), ())),
            preferred_element_type=jnp.float32,
            precision=precision)                                   # (Cout, TM)

        # BN shift + ReLU epilogue in f32; lane-dense store (lane dim = Ho*Wo).
        o_ref[0, :, :] = jnp.maximum(acc + shift_ref[...], 0.0).astype(o_ref.dtype)

    return kernel


@functools.partial(jax.jit, static_argnames=("padding", "eps", "compute_dtype"))
def basic_conv2d_forward(x, weight, gamma, beta, running_mean, running_var,
                         *, padding=1, eps=1e-3, compute_dtype=jnp.bfloat16):
    """BasicConv2d forward (stride 1, symmetric padding), eval-mode BN.

    x      : (N, Cin, H, W)      float32 (NCHW, consumed as-is — no transposes)
    weight : (Cout, Cin, KH, KW) float32 (PyTorch layout, bias=False)
    returns: (N, Cout, Ho, Wo)   float32 (NCHW)
    """
    # TODO(synk): only stride=1 / dilation=1 symmetric padding is implemented.
    N, Cin, H, W = x.shape
    Cout, Cin_w, KH, KW = weight.shape
    assert Cin_w == Cin
    Ho = H + 2 * padding - KH + 1
    Wo = W + 2 * padding - KW + 1
    TM = Ho * Wo
    K = KH * KW * Cin
    K_pad = _round_up(K, 16)            # sublane-friendly for both f32 and bf16

    # ---- eval-mode BN fold: y = conv(x) * scale + shift; scale folded into W ----
    # TODO(synk): training-mode BN (batch stats + running-stat updates) is not
    #             reproduced; eval-mode affine fold of running stats is used.
    scale = gamma / jnp.sqrt(running_var + eps)                     # (Cout,)
    shift = (beta - running_mean * scale).reshape(Cout, 1).astype(jnp.float32)

    # (Cout, Cin, KH, KW) -> (Cout, KH, KW, Cin) -> (Cout, K); column order
    # (kh, kw, ci) matches the patch-row order built in the kernel.  Tiny arrays.
    w_mat = jnp.transpose(weight, (0, 2, 3, 1)).reshape(Cout, K) * scale[:, None]
    w_mat = jnp.pad(w_mat, ((0, 0), (0, K_pad - K))).astype(compute_dtype)

    precision = (lax.Precision.HIGHEST if compute_dtype == jnp.float32
                 else lax.Precision.DEFAULT)
    kernel = _make_kernel(Cin, H, W, KH, KW, padding, Ho, Wo, K_pad,
                          compute_dtype, precision)

    # VMEM budget: double-buffered pipeline buffers + the patch scratch, with
    # headroom; capped below v7x's 64 MiB physical VMEM.
    cbytes = jnp.dtype(compute_dtype).itemsize
    xbytes = jnp.dtype(x.dtype).itemsize
    est = (2 * Cin * H * W * xbytes            # input block (double buffered)
           + 2 * Cout * K_pad * cbytes         # resident weight
           + 2 * Cout * 4                      # resident shift
           + 2 * Cout * TM * 4                 # output block (double buffered)
           + K_pad * TM * 4)                   # patch scratch
    vmem_limit = int(min(48 * 2 ** 20, max(32 * 2 ** 20, 2 * est)))

    out_flat = pl.pallas_call(
        kernel,
        out_shape=jax.ShapeDtypeStruct((N, Cout, TM), jnp.float32),
        grid_spec=pltpu.PrefetchScalarGridSpec(
            num_scalar_prefetch=0,
            grid=(N,),                                    # one image per step
            in_specs=[
                pl.BlockSpec((1, Cin, H, W), lambda n: (n, 0, 0, 0)),
                pl.BlockSpec((Cout, K_pad), lambda n: (0, 0)),   # resident weights
                pl.BlockSpec((Cout, 1), lambda n: (0, 0)),       # resident BN shift
            ],
            out_specs=pl.BlockSpec((1, Cout, TM), lambda n: (n, 0, 0)),
            scratch_shapes=[pltpu.VMEM((K_pad, TM), jnp.float32)],
        ),
        compiler_params=pltpu.CompilerParams(
            dimension_semantics=("parallel",),            # v7x: one image per TC
            vmem_limit_bytes=vmem_limit),
    )(x, w_mat, shift)

    # Free minor-dim split (bitcast): (N, Cout, Ho*Wo) -> (N, Cout, Ho, Wo) NCHW.
    return out_flat.reshape(N, Cout, Ho, Wo)


def _reference(x, weight, gamma, beta, running_mean, running_var,
               *, padding=1, eps=1e-3):
    """Pure-JAX reference (f32 conv + eval-mode BN + ReLU)."""
    y = lax.conv_general_dilated(
        x, weight, window_strides=(1, 1),
        padding=[(padding, padding), (padding, padding)],
        dimension_numbers=("NCHW", "OIHW", "NCHW"),
        precision=lax.Precision.HIGHEST)
    scale = (gamma / jnp.sqrt(running_var + eps)).reshape(1, -1, 1, 1)
    shift = (beta - running_mean * gamma / jnp.sqrt(running_var + eps)).reshape(1, -1, 1, 1)
    return jnp.maximum(y * scale + shift, 0.0)


if __name__ == "__main__":
    # BasicConv2d(in_channels=4, out_channels=8, kernel_size=3, padding=1)
    N, Cin, H, W = 2, 4, 16, 16
    Cout, KH, KW = 8, 3, 3

    key = jax.random.PRNGKey(0)
    kx, kw, kg, kb, km, kv = jax.random.split(key, 6)

    x = jax.random.normal(kx, (N, Cin, H, W), dtype=jnp.float32)
    weight = jax.random.normal(kw, (Cout, Cin, KH, KW), dtype=jnp.float32) * 0.1
    gamma = 1.0 + 0.1 * jax.random.normal(kg, (Cout,), dtype=jnp.float32)
    beta = 0.1 * jax.random.normal(kb, (Cout,), dtype=jnp.float32)
    running_mean = 0.1 * jax.random.normal(km, (Cout,), dtype=jnp.float32)
    running_var = 1.0 + 0.1 * jax.random.uniform(kv, (Cout,), dtype=jnp.float32)

    ref = _reference(x, weight, gamma, beta, running_mean, running_var,
                     padding=1, eps=1e-3)

    # Default path: bf16 MXU operands, f32 accumulation + f32 BN/ReLU epilogue.
    out_bf16 = basic_conv2d_forward(x, weight, gamma, beta, running_mean, running_var,
                                    padding=1, eps=1e-3)
    out_bf16 = jax.block_until_ready(out_bf16)
    assert out_bf16.shape == (N, Cout, H, W)
    assert jnp.allclose(out_bf16, ref, atol=5e-2, rtol=5e-2), "bf16 mismatch vs reference"

    # Exact-precision path: f32 operands with precision=HIGHEST on the MXU.
    out_f32 = basic_conv2d_forward(x, weight, gamma, beta, running_mean, running_var,
                                   padding=1, eps=1e-3, compute_dtype=jnp.float32)
    out_f32 = jax.block_until_ready(out_f32)
    assert out_f32.shape == (N, Cout, H, W)
    assert jnp.allclose(out_f32, ref, atol=1e-4, rtol=1e-4), "f32 mismatch vs reference"

    print("KERNEL_OK")
</pallas_src>

<mosaic_0001>
module attributes {stable_mosaic.version = 11 : i64} {
  func.func @kernel(%arg0: i32, %arg1: memref<1x4x16x16xf32, #tpu.memory_space<vmem>>, %arg2: memref<8x48xbf16, #tpu.memory_space<vmem>>, %arg3: memref<8x1xf32, #tpu.memory_space<vmem>>, %arg4: memref<1x8x256xf32, #tpu.memory_space<vmem>>, %arg5: memref<48x256xf32, #tpu.memory_space<vmem>>) attributes {dimension_semantics = [#tpu.dimension_semantics<parallel>], iteration_bounds = array<i64: 2>, scalar_prefetch = 0 : i64, scratch_operands = 1 : i64, tpu.core_type = #tpu.core_type<tc>, window_params = [{transform_indices = @transform_0, window_bounds = array<i64: 1, 4, 16, 16>}, {pipeline_mode = #tpu.pipeline_mode<synchronous>, transform_indices = @transform_1, window_bounds = array<i64: 8, 48>}, {pipeline_mode = #tpu.pipeline_mode<synchronous>, transform_indices = @transform_2, window_bounds = array<i64: 8, 1>}, {transform_indices = @transform_3, window_bounds = array<i64: 1, 8, 256>}]} {
    %cst = arith.constant 0.000000e+00 : f32
    %0 = vector.broadcast %cst : f32 to vector<48x256xf32>
    %c0 = arith.constant 0 : index
    %c0_0 = arith.constant 0 : index
    %1 = vector.load %arg5[%c0, %c0_0] : memref<48x256xf32, #tpu.memory_space<vmem>>, vector<48x256xf32>
    tpu.vector_store %arg5[%c0, %c0_0], %0 {strides = array<i32>} : memref<48x256xf32, #tpu.memory_space<vmem>>, vector<48x256xf32>,
    %c0_1 = arith.constant 0 : index
    %c0_2 = arith.constant 0 : index
    %c0_3 = arith.constant 0 : index
    %c0_4 = arith.constant 0 : index
    %2 = vector.load %arg1[%c0_1, %c0_2, %c0_3, %c0_4] : memref<1x4x16x16xf32, #tpu.memory_space<vmem>>, vector<1x4x1x16xf32>
    %3 = vector.shape_cast %2 : vector<1x4x1x16xf32> to vector<4x16xf32>
    %4 = vector.extract_strided_slice %3 {offsets = [0, 0], sizes = [4, 15], strides = [1, 1]} : vector<4x16xf32> to vector<4x15xf32>
    %c0_5 = arith.constant 0 : index
    %c17 = arith.constant 17 : index
    %5 = vector.load %arg5[%c0_5, %c17] : memref<48x256xf32, #tpu.memory_space<vmem>>, vector<4x15xf32>
    tpu.vector_store %arg5[%c0_5, %c17], %4 {strides = array<i32>} : memref<48x256xf32, #tpu.memory_space<vmem>>, vector<4x15xf32>,
    %c4 = arith.constant 4 : index
    %c16 = arith.constant 16 : index
    %6 = vector.load %arg5[%c4, %c16] : memref<48x256xf32, #tpu.memory_space<vmem>>, vector<4x16xf32>
    tpu.vector_store %arg5[%c4, %c16], %3 {strides = array<i32>} : memref<48x256xf32, #tpu.memory_space<vmem>>, vector<4x16xf32>,
    %7 = vector.extract_strided_slice %3 {offsets = [0, 1], sizes = [4, 15], strides = [1, 1]} : vector<4x16xf32> to vector<4x15xf32>
    %c8 = arith.constant 8 : index
    %c16_6 = arith.constant 16 : index
    %8 = vector.load %arg5[%c8, %c16_6] : memref<48x256xf32, #tpu.memory_space<vmem>>, vector<4x15xf32>
    tpu.vector_store %arg5[%c8, %c16_6], %7 {strides = array<i32>} : memref<48x256xf32, #tpu.memory_space<vmem>>, vector<4x15xf32>,
    %9 = vector.extract_strided_slice %3 {offsets = [0, 0], sizes = [4, 15], strides = [1, 1]} : vector<4x16xf32> to vector<4x15xf32>
    %c12 = arith.constant 12 : index
    %c1 = arith.constant 1 : index
    %10 = vector.load %arg5[%c12, %c1] : memref<48x256xf32, #tpu.memory_space<vmem>>, vector<4x15xf32>
    tpu.vector_store %arg5[%c12, %c1], %9 {strides = array<i32>} : memref<48x256xf32, #tpu.memory_space<vmem>>, vector<4x15xf32>,
    %c16_7 = arith.constant 16 : index
    %c0_8 = arith.constant 0 : index
    %11 = vector.load %arg5[%c16_7, %c0_8] : memref<48x256xf32, #tpu.memory_space<vmem>>, vector<4x16xf32>
    tpu.vector_store %arg5[%c16_7, %c0_8], %3 {strides = array<i32>} : memref<48x256xf32, #tpu.memory_space<vmem>>, vector<4x16xf32>,
    %12 = vector.extract_strided_slice %3 {offsets = [0, 1], sizes = [4, 15], strides = [1, 1]} : vector<4x16xf32> to vector<4x15xf32>
    %c20 = arith.constant 20 : index
    %c0_9 = arith.constant 0 : index
    %13 = vector.load %arg5[%c20, %c0_9] : memref<48x256xf32, #tpu.memory_space<vmem>>, vector<4x15xf32>
    tpu.vector_store %arg5[%c20, %c0_9], %12 {strides = array<i32>} : memref<48x256xf32, #tpu.memory_space<vmem>>, vector<4x15xf32>,
    %c0_10 = arith.constant 0 : index
    %c0_11 = arith.constant 0 : index
    %c1_12 = arith.constant 1 : index
    %c0_13 = arith.constant 0 : index
    %14 = vector.load %arg1[%c0_10, %c0_11, %c1_12, %c0_13] : memref<1x4x16x16xf32, #tpu.memory_space<vmem>>, vector<1x4x1x16xf32>
    %15 = vector.shape_cast %14 : vector<1x4x1x16xf32> to vector<4x16xf32>
    %16 = vector.extract_strided_slice %15 {offsets = [0, 0], sizes = [4, 15], strides = [1, 1]} : vector<4x16xf32> to vector<4x15xf32>
    %c0_14 = arith.constant 0 : index
    %c33 = arith.constant 33 : index
    %17 = vector.load %arg5[%c0_14, %c33] : memref<48x256xf32, #tpu.memory_space<vmem>>, vector<4x15xf32>
    tpu.vector_store %arg5[%c0_14, %c33], %16 {strides = array<i32>} : memref<48x256xf32, #tpu.memory_space<vmem>>, vector<4x15xf32>,
    %c4_15 = arith.constant 4 : index
    %c32 = arith.constant 32 : index
    %18 = vector.load %arg5[%c4_15, %c32] : memref<48x256xf32, #tpu.memory_space<vmem>>, vector<4x16xf32>
    tpu.vector_store %arg5[%c4_15, %c32], %15 {strides = array<i32>} : memref<48x256xf32, #tpu.memory_space<vmem>>, vector<4x16xf32>,
    %19 = vector.extract_strided_slice %15 {offsets = [0, 1], sizes = [4, 15], strides = [1, 1]} : vector<4x16xf32> to vector<4x15xf32>
    %c8_16 = arith.constant 8 : index
    %c32_17 = arith.constant 32 : index
    %20 = vector.load %arg5[%c8_16, %c32_17] : memref<48x256xf32, #tpu.memory_space<vmem>>, vector<4x15xf32>
    tpu.vector_store %arg5[%c8_16, %c32_17], %19 {strides = array<i32>} : memref<48x256xf32, #tpu.memory_space<vmem>>, vector<4x15xf32>,
    %21 = vector.extract_strided_slice %15 {offsets = [0, 0], sizes = [4, 15], strides = [1, 1]} : vector<4x16xf32> to vector<4x15xf32>
    %c12_18 = arith.constant 12 : index
    %c17_19 = arith.constant 17 : index
    %22 = vector.load %arg5[%c12_18, %c17_19] : memref<48x256xf32, #tpu.memory_space<vmem>>, vector<4x15xf32>
    tpu.vector_store %arg5[%c12_18, %c17_19], %21 {strides = array<i32>} : memref<48x256xf32, #tpu.memory_space<vmem>>, vector<4x15xf32>,
    %c16_20 = arith.constant 16 : index
    %c16_21 = arith.constant 16 : index
    %23 = vector.load %arg5[%c16_20, %c16_21] : memref<48x256xf32, #tpu.memory_space<vmem>>, vector<4x16xf32>
    tpu.vector_store %arg5[%c16_20, %c16_21], %15 {strides = array<i32>} : memref<48x256xf32, #tpu.memory_space<vmem>>, vector<4x16xf32>,
    %24 = vector.extract_strided_slice %15 {offsets = [0, 1], sizes = [4, 15], strides = [1, 1]} : vector<4x16xf32> to vector<4x15xf32>
    %c20_22 = arith.constant 20 : index
    %c16_23 = arith.constant 16 : index
    %25 = vector.load %arg5[%c20_22, %c16_23] : memref<48x256xf32, #tpu.memory_space<vmem>>, vector<4x15xf32>
    tpu.vector_store %arg5[%c20_22, %c16_23], %24 {strides = array<i32>} : memref<48x256xf32, #tpu.memory_space<vmem>>, vector<4x15xf32>,
    %26 = vector.extract_strided_slice %15 {offsets = [0, 0], sizes = [4, 15], strides = [1, 1]} : vector<4x16xf32> to vector<4x15xf32>
    %c24 = arith.constant 24 : index
    %c1_24 = arith.constant 1 : index
    %27 = vector.load %arg5[%c24, %c1_24] : memref<48x256xf32, #tpu.memory_space<vmem>>, vector<4x15xf32>
    tpu.vector_store %arg5[%c24, %c1_24], %26 {strides = array<i32>} : memref<48x256xf32, #tpu.memory_space<vmem>>, vector<4x15xf32>,
    %c28 = arith.constant 28 : index
    %c0_25 = arith.constant 0 : index
    %28 = vector.load %arg5[%c28, %c0_25] : memref<48x256xf32, #tpu.memory_space<vmem>>, vector<4x16xf32>
    tpu.vector_store %arg5[%c28, %c0_25], %15 {strides = array<i32>} : memref<48x256xf32, #tpu.memory_space<vmem>>, vector<4x16xf32>,
    %29 = vector.extract_strided_slice %15 {offsets = [0, 1], sizes = [4, 15], strides = [1, 1]} : vector<4x16xf32> to vector<4x15xf32>
    %c32_26 = arith.constant 32 : index
    %c0_27 = arith.constant 0 : index
    %30 = vector.load %arg5[%c32_26, %c0_27] : memref<48x256xf32, #tpu.memory_space<vmem>>, vector<4x15xf32>
    tpu.vector_store %arg5[%c32_26, %c0_27], %29 {strides = array<i32>} : memref<48x256xf32, #tpu.memory_space<vmem>>, vector<4x15xf32>,
    %c0_28 = arith.constant 0 : index
    %c0_29 = arith.constant 0 : index
    %c2 = arith.constant 2 : index
    %c0_30 = arith.constant 0 : index
    %31 = vector.load %arg1[%c0_28, %c0_29, %c2, %c0_30] : memref<1x4x16x16xf32, #tpu.memory_space<vmem>>, vector<1x4x1x16xf32>
    %32 = vector.shape_cast %31 : vector<1x4x1x16xf32> to vector<4x16xf32>
    %33 = vector.extract_strided_slice %32 {offsets = [0, 0], sizes = [4, 15], strides = [1, 1]} : vector<4x16xf32> to vector<4x15xf32>
    %c0_31 = arith.constant 0 : index
    %c49 = arith.constant 49 : index
    %34 = vector.load %arg5[%c0_31, %c49] : memref<48x256xf32, #tpu.memory_space<vmem>>, vector<4x15xf32>
    tpu.vector_store %arg5[%c0_31, %c49], %33 {strides = array<i32>} : memref<48x256xf32, #tpu.memory_space<vmem>>, vector<4x15xf32>,
    %c4_32 = arith.constant 4 : index
    %c48 = arith.constant 48 : index
    %35 = vector.load %arg5[%c4_32, %c48] : memref<48x256xf32, #tpu.memory_space<vmem>>, vector<4x16xf32>
    tpu.vector_store %arg5[%c4_32, %c48], %32 {strides = array<i32>} : memref<48x256xf32, #tpu.memory_space<vmem>>, vector<4x16xf32>,
    %36 = vector.extract_strided_slice %32 {offsets = [0, 1], sizes = [4, 15], strides = [1, 1]} : vector<4x16xf32> to vector<4x15xf32>
    %c8_33 = arith.constant 8 : index
    %c48_34 = arith.constant 48 : index
    %37 = vector.load %arg5[%c8_33, %c48_34] : memref<48x256xf32, #tpu.memory_space<vmem>>, vector<4x15xf32>
    tpu.vector_store %arg5[%c8_33, %c48_34], %36 {strides = array<i32>} : memref<48x256xf32, #tpu.memory_space<vmem>>, vector<4x15xf32>,
    %38 = vector.extract_strided_slice %32 {offsets = [0, 0], sizes = [4, 15], strides = [1, 1]} : vector<4x16xf32> to vector<4x15xf32>
    %c12_35 = arith.constant 12 : index
    %c33_36 = arith.constant 33 : index
    %39 = vector.load %arg5[%c12_35, %c33_36] : memref<48x256xf32, #tpu.memory_space<vmem>>, vector<4x15xf32>
    tpu.vector_store %arg5[%c12_35, %c33_36], %38 {strides = array<i32>} : memref<48x256xf32, #tpu.memory_space<vmem>>, vector<4x15xf32>,
    %c16_37 = arith.constant 16 : index
    %c32_38 = arith.constant 32 : index
    %40 = vector.load %arg5[%c16_37, %c32_38] : memref<48x256xf32, #tpu.memory_space<vmem>>, vector<4x16xf32>
    tpu.vector_store %arg5[%c16_37, %c32_38], %32 {strides = array<i32>} : memref<48x256xf32, #tpu.memory_space<vmem>>, vector<4x16xf32>,
    %41 = vector.extract_strided_slice %32 {offsets = [0, 1], sizes = [4, 15], strides = [1, 1]} : vector<4x16xf32> to vector<4x15xf32>
    %c20_39 = arith.constant 20 : index
    %c32_40 = arith.constant 32 : index
    %42 = vector.load %arg5[%c20_39, %c32_40] : memref<48x256xf32, #tpu.memory_space<vmem>>, vector<4x15xf32>
    tpu.vector_store %arg5[%c20_39, %c32_40], %41 {strides = array<i32>} : memref<48x256xf32, #tpu.memory_space<vmem>>, vector<4x15xf32>,
    %43 = vector.extract_strided_slice %32 {offsets = [0, 0], sizes = [4, 15], strides = [1, 1]} : vector<4x16xf32> to vector<4x15xf32>
    %c24_41 = arith.constant 24 : index
    %c17_42 = arith.constant 17 : index
    %44 = vector.load %arg5[%c24_41, %c17_42] : memref<48x256xf32, #tpu.memory_space<vmem>>, vector<4x15xf32>
    tpu.vector_store %arg5[%c24_41, %c17_42], %43 {strides = array<i32>} : memref<48x256xf32, #tpu.memory_space<vmem>>, vector<4x15xf32>,
    %c28_43 = arith.constant 28 : index
    %c16_44 = arith.constant 16 : index
    %45 = vector.load %arg5[%c28_43, %c16_44] : memref<48x256xf32, #tpu.memory_space<vmem>>, vector<4x16xf32>
    tpu.vector_store %arg5[%c28_43, %c16_44], %32 {strides = array<i32>} : memref<48x256xf32, #tpu.memory_space<vmem>>, vector<4x16xf32>,
    %46 = vector.extract_strided_slice %32 {offsets = [0, 1], sizes = [4, 15], strides = [1, 1]} : vector<4x16xf32> to vector<4x15xf32>
    %c32_45 = arith.constant 32 : index
    %c16_46 = arith.constant 16 : index
    %47 = vector.load %arg5[%c32_45, %c16_46] : memref<48x256xf32, #tpu.memory_space<vmem>>, vector<4x15xf32>
    tpu.vector_store %arg5[%c32_45, %c16_46], %46 {strides = array<i32>} : memref<48x256xf32, #tpu.memory_space<vmem>>, vector<4x15xf32>,
    %c0_47 = arith.constant 0 : index
    %c0_48 = arith.constant 0 : index
    %c3 = arith.constant 3 : index
    %c0_49 = arith.constant 0 : index
    %48 = vector.load %arg1[%c0_47, %c0_48, %c3, %c0_49] : memref<1x4x16x16xf32, #tpu.memory_space<vmem>>, vector<1x4x1x16xf32>
    %49 = vector.shape_cast %48 : vector<1x4x1x16xf32> to vector<4x16xf32>
    %50 = vector.extract_strided_slice %49 {offsets = [0, 0], sizes = [4, 15], strides = [1, 1]} : vector<4x16xf32> to vector<4x15xf32>
    %c0_50 = arith.constant 0 : index
    %c65 = arith.constant 65 : index
    %51 = vector.load %arg5[%c0_50, %c65] : memref<48x256xf32, #tpu.memory_space<vmem>>, vector<4x15xf32>
    tpu.vector_store %arg5[%c0_50, %c65], %50 {strides = array<i32>} : memref<48x256xf32, #tpu.memory_space<vmem>>, vector<4x15xf32>,
    %c4_51 = arith.constant 4 : index
    %c64 = arith.constant 64 : index
    %52 = vector.load %arg5[%c4_51, %c64] : memref<48x256xf32, #tpu.memory_space<vmem>>, vector<4x16xf32>
    tpu.vector_store %arg5[%c4_51, %c64], %49 {strides = array<i32>} : memref<48x256xf32, #tpu.memory_space<vmem>>, vector<4x16xf32>,
    %53 = vector.extract_strided_slice %49 {offsets = [0, 1], sizes = [4, 15], strides = [1, 1]} : vector<4x16xf32> to vector<4x15xf32>
    %c8_52 = arith.constant 8 : index
    %c64_53 = arith.constant 64 : index
    %54 = vector.load %arg5[%c8_52, %c64_53] : memref<48x256xf32, #tpu.memory_space<vmem>>, vector<4x15xf32>
    tpu.vector_store %arg5[%c8_52, %c64_53], %53 {strides = array<i32>} : memref<48x256xf32, #tpu.memory_space<vmem>>, vector<4x15xf32>,
    %55 = vector.extract_strided_slice %49 {offsets = [0, 0], sizes = [4, 15], strides = [1, 1]} : vector<4x16xf32> to vector<4x15xf32>
    %c12_54 = arith.constant 12 : index
    %c49_55 = arith.constant 49 : index
    %56 = vector.load %arg5[%c12_54, %c49_55] : memref<48x256xf32, #tpu.memory_space<vmem>>, vector<4x15xf32>
    tpu.vector_store %arg5[%c12_54, %c49_55], %55 {strides = array<i32>} : memref<48x256xf32, #tpu.memory_space<vmem>>, vector<4x15xf32>,
    %c16_56 = arith.constant 16 : index
    %c48_57 = arith.constant 48 : index
    %57 = vector.load %arg5[%c16_56, %c48_57] : memref<48x256xf32, #tpu.memory_space<vmem>>, vector<4x16xf32>
    tpu.vector_store %arg5[%c16_56, %c48_57], %49 {strides = array<i32>} : memref<48x256xf32, #tpu.memory_space<vmem>>, vector<4x16xf32>,
    %58 = vector.extract_strided_slice %49 {offsets = [0, 1], sizes = [4, 15], strides = [1, 1]} : vector<4x16xf32> to vector<4x15xf32>
    %c20_58 = arith.constant 20 : index
    %c48_59 = arith.constant 48 : index
    %59 = vector.load %arg5[%c20_58, %c48_59] : memref<48x256xf32, #tpu.memory_space<vmem>>, vector<4x15xf32>
    tpu.vector_store %arg5[%c20_58, %c48_59], %58 {strides = array<i32>} : memref<48x256xf32, #tpu.memory_space<vmem>>, vector<4x15xf32>,
    %60 = vector.extract_strided_slice %49 {offsets = [0, 0], sizes = [4, 15], strides = [1, 1]} : vector<4x16xf32> to vector<4x15xf32>
    %c24_60 = arith.constant 24 : index
    %c33_61 = arith.constant 33 : index
    %61 = vector.load %arg5[%c24_60, %c33_61] : memref<48x256xf32, #tpu.memory_space<vmem>>, vector<4x15xf32>
    tpu.vector_store %arg5[%c24_60, %c33_61], %60 {strides = array<i32>} : memref<48x256xf32, #tpu.memory_space<vmem>>, vector<4x15xf32>,
    %c28_62 = arith.constant 28 : index
    %c32_63 = arith.constant 32 : index
    %62 = vector.load %arg5[%c28_62, %c32_63] : memref<48x256xf32, #tpu.memory_space<vmem>>, vector<4x16xf32>
    tpu.vector_store %arg5[%c28_62, %c32_63], %49 {strides = array<i32>} : memref<48x256xf32, #tpu.memory_space<vmem>>, vector<4x16xf32>,
    %63 = vector.extract_strided_slice %49 {offsets = [0, 1], sizes = [4, 15], strides = [1, 1]} : vector<4x16xf32> to vector<4x15xf32>
    %c32_64 = arith.constant 32 : index
    %c32_65 = arith.constant 32 : index
    %64 = vector.load %arg5[%c32_64, %c32_65] : memref<48x256xf32, #tpu.memory_space<vmem>>, vector<4x15xf32>
    tpu.vector_store %arg5[%c32_64, %c32_65], %63 {strides = array<i32>} : memref<48x256xf32, #tpu.memory_space<vmem>>, vector<4x15xf32>,
    %c0_66 = arith.constant 0 : index
    %c0_67 = arith.constant 0 : index
    %c4_68 = arith.constant 4 : index
    %c0_69 = arith.constant 0 : index
    %65 = vector.load %arg1[%c0_66, %c0_67, %c4_68, %c0_69] : memref<1x4x16x16xf32, #tpu.memory_space<vmem>>, vector<1x4x1x16xf32>
    %66 = vector.shape_cast %65 : vector<1x4x1x16xf32> to vector<4x16xf32>
    %67 = vector.extract_strided_slice %66 {offsets = [0, 0], sizes = [4, 15], strides = [1, 1]} : vector<4x16xf32> to vector<4x15xf32>
    %c0_70 = arith.constant 0 : index
    %c81 = arith.constant 81 : index
    %68 = vector.load %arg5[%c0_70, %c81] : memref<48x256xf32, #tpu.memory_space<vmem>>, vector<4x15xf32>
    tpu.vector_store %arg5[%c0_70, %c81], %67 {strides = array<i32>} : memref<48x256xf32, #tpu.memory_space<vmem>>, vector<4x15xf32>,
    %c4_71 = arith.constant 4 : index
    %c80 = arith.constant 80 : index
    %69 = vector.load %arg5[%c4_71, %c80] : memref<48x256xf32, #tpu.memory_space<vmem>>, vector<4x16xf32>
    tpu.vector_store %arg5[%c4_71, %c80], %66 {strides = array<i32>} : memref<48x256xf32, #tpu.memory_space<vmem>>, vector<4x16xf32>,
    %70 = vector.extract_strided_slice %66 {offsets = [0, 1], sizes = [4, 15], strides = [1, 1]} : vector<4x16xf32> to vector<4x15xf32>
    %c8_72 = arith.constant 8 : index
    %c80_73 = arith.constant 80 : index
    %71 = vector.load %arg5[%c8_72, %c80_73] : memref<48x256xf32, #tpu.memory_space<vmem>>, vector<4x15xf32>
    tpu.vector_store %arg5[%c8_72, %c80_73], %70 {strides = array<i32>} : memref<48x256xf32, #tpu.memory_space<vmem>>, vector<4x15xf32>,
    %72 = vector.extract_strided_slice %66 {offsets = [0, 0], sizes = [4, 15], strides = [1, 1]} : vector<4x16xf32> to vector<4x15xf32>
    %c12_74 = arith.constant 12 : index
    %c65_75 = arith.constant 65 : index
    %73 = vector.load %arg5[%c12_74, %c65_75] : memref<48x256xf32, #tpu.memory_space<vmem>>, vector<4x15xf32>
    tpu.vector_store %arg5[%c12_74, %c65_75], %72 {strides = array<i32>} : memref<48x256xf32, #tpu.memory_space<vmem>>, vector<4x15xf32>,
    %c16_76 = arith.constant 16 : index
    %c64_77 = arith.constant 64 : index
    %74 = vector.load %arg5[%c16_76, %c64_77] : memref<48x256xf32, #tpu.memory_space<vmem>>, vector<4x16xf32>
    tpu.vector_store %arg5[%c16_76, %c64_77], %66 {strides = array<i32>} : memref<48x256xf32, #tpu.memory_space<vmem>>, vector<4x16xf32>,
    %75 = vector.extract_strided_slice %66 {offsets = [0, 1], sizes = [4, 15], strides = [1, 1]} : vector<4x16xf32> to vector<4x15xf32>
    %c20_78 = arith.constant 20 : index
    %c64_79 = arith.constant 64 : index
    %76 = vector.load %arg5[%c20_78, %c64_79] : memref<48x256xf32, #tpu.memory_space<vmem>>, vector<4x15xf32>
    tpu.vector_store %arg5[%c20_78, %c64_79], %75 {strides = array<i32>} : memref<48x256xf32, #tpu.memory_space<vmem>>, vector<4x15xf32>,
    %77 = vector.extract_strided_slice %66 {offsets = [0, 0], sizes = [4, 15], strides = [1, 1]} : vector<4x16xf32> to vector<4x15xf32>
    %c24_80 = arith.constant 24 : index
    %c49_81 = arith.constant 49 : index
    %78 = vector.load %arg5[%c24_80, %c49_81] : memref<48x256xf32, #tpu.memory_space<vmem>>, vector<4x15xf32>
    tpu.vector_store %arg5[%c24_80, %c49_81], %77 {strides = array<i32>} : memref<48x256xf32, #tpu.memory_space<vmem>>, vector<4x15xf32>,
    %c28_82 = arith.constant 28 : index
    %c48_83 = arith.constant 48 : index
    %79 = vector.load %arg5[%c28_82, %c48_83] : memref<48x256xf32, #tpu.memory_space<vmem>>, vector<4x16xf32>
    tpu.vector_store %arg5[%c28_82, %c48_83], %66 {strides = array<i32>} : memref<48x256xf32, #tpu.memory_space<vmem>>, vector<4x16xf32>,
    %80 = vector.extract_strided_slice %66 {offsets = [0, 1], sizes = [4, 15], strides = [1, 1]} : vector<4x16xf32> to vector<4x15xf32>
    %c32_84 = arith.constant 32 : index
    %c48_85 = arith.constant 48 : index
    %81 = vector.load %arg5[%c32_84, %c48_85] : memref<48x256xf32, #tpu.memory_space<vmem>>, vector<4x15xf32>
    tpu.vector_store %arg5[%c32_84, %c48_85], %80 {strides = array<i32>} : memref<48x256xf32, #tpu.memory_space<vmem>>, vector<4x15xf32>,
    %c0_86 = arith.constant 0 : index
    %c0_87 = arith.constant 0 : index
    %c5 = arith.constant 5 : index
    %c0_88 = arith.constant 0 : index
    %82 = vector.load %arg1[%c0_86, %c0_87, %c5, %c0_88] : memref<1x4x16x16xf32, #tpu.memory_space<vmem>>, vector<1x4x1x16xf32>
    %83 = vector.shape_cast %82 : vector<1x4x1x16xf32> to vector<4x16xf32>
    %84 = vector.extract_strided_slice %83 {offsets = [0, 0], sizes = [4, 15], strides = [1, 1]} : vector<4x16xf32> to vector<4x15xf32>
    %c0_89 = arith.constant 0 : index
    %c97 = arith.constant 97 : index
    %85 = vector.load %arg5[%c0_89, %c97] : memref<48x256xf32, #tpu.memory_space<vmem>>, vector<4x15xf32>
    tpu.vector_store %arg5[%c0_89, %c97], %84 {strides = array<i32>} : memref<48x256xf32, #tpu.memory_space<vmem>>, vector<4x15xf32>,
    %c4_90 = arith.constant 4 : index
    %c96 = arith.constant 96 : index
    %86 = vector.load %arg5[%c4_90, %c96] : memref<48x256xf32, #tpu.memory_space<vmem>>, vector<4x16xf32>
    tpu.vector_store %arg5[%c4_90, %c96], %83 {strides = array<i32>} : memref<48x256xf32, #tpu.memory_space<vmem>>, vector<4x16xf32>,
    %87 = vector.extract_strided_slice %83 {offsets = [0, 1], sizes = [4, 15], strides = [1, 1]} : vector<4x16xf32> to vector<4x15xf32>
    %c8_91 = arith.constant 8 : index
    %c96_92 = arith.constant 96 : index
    %88 = vector.load %arg5[%c8_91, %c96_92] : memref<48x256xf32, #tpu.memory_space<vmem>>, vector<4x15xf32>
    tpu.vector_store %arg5[%c8_91, %c96_92], %87 {strides = array<i32>} : memref<48x256xf32, #tpu.memory_space<vmem>>, vector<4x15xf32>,
    %89 = vector.extract_strided_slice %83 {offsets = [0, 0], sizes = [4, 15], strides = [1, 1]} : vector<4x16xf32> to vector<4x15xf32>
    %c12_93 = arith.constant 12 : index
    %c81_94 = arith.constant 81 : index
    %90 = vector.load %arg5[%c12_93, %c81_94] : memref<48x256xf32, #tpu.memory_space<vmem>>, vector<4x15xf32>
    tpu.vector_store %arg5[%c12_93, %c81_94], %89 {strides = array<i32>} : memref<48x256xf32, #tpu.memory_space<vmem>>, vector<4x15xf32>,
    %c16_95 = arith.constant 16 : index
    %c80_96 = arith.constant 80 : index
    %91 = vector.load %arg5[%c16_95, %c80_96] : memref<48x256xf32, #tpu.memory_space<vmem>>, vector<4x16xf32>
    tpu.vector_store %arg5[%c16_95, %c80_96], %83 {strides = array<i32>} : memref<48x256xf32, #tpu.memory_space<vmem>>, vector<4x16xf32>,
    %92 = vector.extract_strided_slice %83 {offsets = [0, 1], sizes = [4, 15], strides = [1, 1]} : vector<4x16xf32> to vector<4x15xf32>
    %c20_97 = arith.constant 20 : index
    %c80_98 = arith.constant 80 : index
    %93 = vector.load %arg5[%c20_97, %c80_98] : memref<48x256xf32, #tpu.memory_space<vmem>>, vector<4x15xf32>
    tpu.vector_store %arg5[%c20_97, %c80_98], %92 {strides = array<i32>} : memref<48x256xf32, #tpu.memory_space<vmem>>, vector<4x15xf32>,
    %94 = vector.extract_strided_slice %83 {offsets = [0, 0], sizes = [4, 15], strides = [1, 1]} : vector<4x16xf32> to vector<4x15xf32>
    %c24_99 = arith.constant 24 : index
    %c65_100 = arith.constant 65 : index
    %95 = vector.load %arg5[%c24_99, %c65_100] : memref<48x256xf32, #tpu.memory_space<vmem>>, vector<4x15xf32>
    tpu.vector_store %arg5[%c24_99, %c65_100], %94 {strides = array<i32>} : memref<48x256xf32, #tpu.memory_space<vmem>>, vector<4x15xf32>,
    %c28_101 = arith.constant 28 : index
    %c64_102 = arith.constant 64 : index
    %96 = vector.load %arg5[%c28_101, %c64_102] : memref<48x256xf32, #tpu.memory_space<vmem>>, vector<4x16xf32>
    tpu.vector_store %arg5[%c28_101, %c64_102], %83 {strides = array<i32>} : memref<48x256xf32, #tpu.memory_space<vmem>>, vector<4x16xf32>,
    %97 = vector.extract_strided_slice %83 {offsets = [0, 1], sizes = [4, 15], strides = [1, 1]} : vector<4x16xf32> to vector<4x15xf32>
    %c32_103 = arith.constant 32 : index
    %c64_104 = arith.constant 64 : index
    %98 = vector.load %arg5[%c32_103, %c64_104] : memref<48x256xf32, #tpu.memory_space<vmem>>, vector<4x15xf32>
    tpu.vector_store %arg5[%c32_103, %c64_104], %97 {strides = array<i32>} : memref<48x256xf32, #tpu.memory_space<vmem>>, vector<4x15xf32>,
    %c0_105 = arith.constant 0 : index
    %c0_106 = arith.constant 0 : index
    %c6 = arith.constant 6 : index
    %c0_107 = arith.constant 0 : index
    %99 = vector.load %arg1[%c0_105, %c0_106, %c6, %c0_107] : memref<1x4x16x16xf32, #tpu.memory_space<vmem>>, vector<1x4x1x16xf32>
    %100 = vector.shape_cast %99 : vector<1x4x1x16xf32> to vector<4x16xf32>
    %101 = vector.extract_strided_slice %100 {offsets = [0, 0], sizes = [4, 15], strides = [1, 1]} : vector<4x16xf32> to vector<4x15xf32>
    %c0_108 = arith.constant 0 : index
    %c113 = arith.constant 113 : index
    %102 = vector.load %arg5[%c0_108, %c113] : memref<48x256xf32, #tpu.memory_space<vmem>>, vector<4x15xf32>
    tpu.vector_store %arg5[%c0_108, %c113], %101 {strides = array<i32>} : memref<48x256xf32, #tpu.memory_space<vmem>>, vector<4x15xf32>,
    %c4_109 = arith.constant 4 : index
    %c112 = arith.constant 112 : index
    %103 = vector.load %arg5[%c4_109, %c112] : memref<48x256xf32, #tpu.memory_space<vmem>>, vector<4x16xf32>
    tpu.vector_store %arg5[%c4_109, %c112], %100 {strides = array<i32>} : memref<48x256xf32, #tpu.memory_space<vmem>>, vector<4x16xf32>,
    %104 = vector.extract_strided_slice %100 {offsets = [0, 1], sizes = [4, 15], strides = [1, 1]} : vector<4x16xf32> to vector<4x15xf32>
    %c8_110 = arith.constant 8 : index
    %c112_111 = arith.constant 112 : index
    %105 = vector.load %arg5[%c8_110, %c112_111] : memref<48x256xf32, #tpu.memory_space<vmem>>, vector<4x15xf32>
    tpu.vector_store %arg5[%c8_110, %c112_111], %104 {strides = array<i32>} : memref<48x256xf32, #tpu.memory_space<vmem>>, vector<4x15xf32>,
    %106 = vector.extract_strided_slice %100 {offsets = [0, 0], sizes = [4, 15], strides = [1, 1]} : vector<4x16xf32> to vector<4x15xf32>
    %c12_112 = arith.constant 12 : index
    %c97_113 = arith.constant 97 : index
    %107 = vector.load %arg5[%c12_112, %c97_113] : memref<48x256xf32, #tpu.memory_space<vmem>>, vector<4x15xf32>
    tpu.vector_store %arg5[%c12_112, %c97_113], %106 {strides = array<i32>} : memref<48x256xf32, #tpu.memory_space<vmem>>, vector<4x15xf32>,
    %c16_114 = arith.constant 16 : index
    %c96_115 = arith.constant 96 : index
    %108 = vector.load %arg5[%c16_114, %c96_115] : memref<48x256xf32, #tpu.memory_space<vmem>>, vector<4x16xf32>
    tpu.vector_store %arg5[%c16_114, %c96_115], %100 {strides = array<i32>} : memref<48x256xf32, #tpu.memory_space<vmem>>, vector<4x16xf32>,
    %109 = vector.extract_strided_slice %100 {offsets = [0, 1], sizes = [4, 15], strides = [1, 1]} : vector<4x16xf32> to vector<4x15xf32>
    %c20_116 = arith.constant 20 : index
    %c96_117 = arith.constant 96 : index
    %110 = vector.load %arg5[%c20_116, %c96_117] : memref<48x256xf32, #tpu.memory_space<vmem>>, vector<4x15xf32>
    tpu.vector_store %arg5[%c20_116, %c96_117], %109 {strides = array<i32>} : memref<48x256xf32, #tpu.memory_space<vmem>>, vector<4x15xf32>,
    %111 = vector.extract_strided_slice %100 {offsets = [0, 0], sizes = [4, 15], strides = [1, 1]} : vector<4x16xf32> to vector<4x15xf32>
    %c24_118 = arith.constant 24 : index
    %c81_119 = arith.constant 81 : index
    %112 = vector.load %arg5[%c24_118, %c81_119] : memref<48x256xf32, #tpu.memory_space<vmem>>, vector<4x15xf32>
    tpu.vector_store %arg5[%c24_118, %c81_119], %111 {strides = array<i32>} : memref<48x256xf32, #tpu.memory_space<vmem>>, vector<4x15xf32>,
    %c28_120 = arith.constant 28 : index
    %c80_121 = arith.constant 80 : index
    %113 = vector.load %arg5[%c28_120, %c80_121] : memref<48x256xf32, #tpu.memory_space<vmem>>, vector<4x16xf32>
    tpu.vector_store %arg5[%c28_120, %c80_121], %100 {strides = array<i32>} : memref<48x256xf32, #tpu.memory_space<vmem>>, vector<4x16xf32>,
    %114 = vector.extract_strided_slice %100 {offsets = [0, 1], sizes = [4, 15], strides = [1, 1]} : vector<4x16xf32> to vector<4x15xf32>
    %c32_122 = arith.constant 32 : index
    %c80_123 = arith.constant 80 : index
    %115 = vector.load %arg5[%c32_122, %c80_123] : memref<48x256xf32, #tpu.memory_space<vmem>>, vector<4x15xf32>
    tpu.vector_store %arg5[%c32_122, %c80_123], %114 {strides = array<i32>} : memref<48x256xf32, #tpu.memory_space<vmem>>, vector<4x15xf32>,
    %c0_124 = arith.constant 0 : index
    %c0_125 = arith.constant 0 : index
    %c7 = arith.constant 7 : index
    %c0_126 = arith.constant 0 : index
    %116 = vector.load %arg1[%c0_124, %c0_125, %c7, %c0_126] : memref<1x4x16x16xf32, #tpu.memory_space<vmem>>, vector<1x4x1x16xf32>
    %117 = vector.shape_cast %116 : vector<1x4x1x16xf32> to vector<4x16xf32>
    %118 = vector.extract_strided_slice %117 {offsets = [0, 0], sizes = [4, 15], strides = [1, 1]} : vector<4x16xf32> to vector<4x15xf32>
    %c0_127 = arith.constant 0 : index
    %c129 = arith.constant 129 : index
    %119 = vector.load %arg5[%c0_127, %c129] : memref<48x256xf32, #tpu.memory_space<vmem>>, vector<4x15xf32>
    tpu.vector_store %arg5[%c0_127, %c129], %118 {strides = array<i32>} : memref<48x256xf32, #tpu.memory_space<vmem>>, vector<4x15xf32>,
    %c4_128 = arith.constant 4 : index
    %c128 = arith.constant 128 : index
    %120 = vector.load %arg5[%c4_128, %c128] : memref<48x256xf32, #tpu.memory_space<vmem>>, vector<4x16xf32>
    tpu.vector_store %arg5[%c4_128, %c128], %117 {strides = array<i32>} : memref<48x256xf32, #tpu.memory_space<vmem>>, vector<4x16xf32>,
    %121 = vector.extract_strided_slice %117 {offsets = [0, 1], sizes = [4, 15], strides = [1, 1]} : vector<4x16xf32> to vector<4x15xf32>
    %c8_129 = arith.constant 8 : index
    %c128_130 = arith.constant 128 : index
    %122 = vector.load %arg5[%c8_129, %c128_130] : memref<48x256xf32, #tpu.memory_space<vmem>>, vector<4x15xf32>
    tpu.vector_store %arg5[%c8_129, %c128_130], %121 {strides = array<i32>} : memref<48x256xf32, #tpu.memory_space<vmem>>, vector<4x15xf32>,
    %123 = vector.extract_strided_slice %117 {offsets = [0, 0], sizes = [4, 15], strides = [1, 1]} : vector<4x16xf32> to vector<4x15xf32>
    %c12_131 = arith.constant 12 : index
    %c113_132 = arith.constant 113 : index
    %124 = vector.load %arg5[%c12_131, %c113_132] : memref<48x256xf32, #tpu.memory_space<vmem>>, vector<4x15xf32>
    tpu.vector_store %arg5[%c12_131, %c113_132], %123 {strides = array<i32>} : memref<48x256xf32, #tpu.memory_space<vmem>>, vector<4x15xf32>,
    %c16_133 = arith.constant 16 : index
    %c112_134 = arith.constant 112 : index
    %125 = vector.load %arg5[%c16_133, %c112_134] : memref<48x256xf32, #tpu.memory_space<vmem>>, vector<4x16xf32>
    tpu.vector_store %arg5[%c16_133, %c112_134], %117 {strides = array<i32>} : memref<48x256xf32, #tpu.memory_space<vmem>>, vector<4x16xf32>,
    %126 = vector.extract_strided_slice %117 {offsets = [0, 1], sizes = [4, 15], strides = [1, 1]} : vector<4x16xf32> to vector<4x15xf32>
    %c20_135 = arith.constant 20 : index
    %c112_136 = arith.constant 112 : index
    %127 = vector.load %arg5[%c20_135, %c112_136] : memref<48x256xf32, #tpu.memory_space<vmem>>, vector<4x15xf32>
    tpu.vector_store %arg5[%c20_135, %c112_136], %126 {strides = array<i32>} : memref<48x256xf32, #tpu.memory_space<vmem>>, vector<4x15xf32>,
    %128 = vector.extract_strided_slice %117 {offsets = [0, 0], sizes = [4, 15], strides = [1, 1]} : vector<4x16xf32> to vector<4x15xf32>
    %c24_137 = arith.constant 24 : index
    %c97_138 = arith.constant 97 : index
    %129 = vector.load %arg5[%c24_137, %c97_138] : memref<48x256xf32, #tpu.memory_space<vmem>>, vector<4x15xf32>
    tpu.vector_store %arg5[%c24_137, %c97_138], %128 {strides = array<i32>} : memref<48x256xf32, #tpu.memory_space<vmem>>, vector<4x15xf32>,
    %c28_139 = arith.constant 28 : index
    %c96_140 = arith.constant 96 : index
    %130 = vector.load %arg5[%c28_139, %c96_140] : memref<48x256xf32, #tpu.memory_space<vmem>>, vector<4x16xf32>
    tpu.vector_store %arg5[%c28_139, %c96_140], %117 {strides = array<i32>} : memref<48x256xf32, #tpu.memory_space<vmem>>, vector<4x16xf32>,
    %131 = vector.extract_strided_slice %117 {offsets = [0, 1], sizes = [4, 15], strides = [1, 1]} : vector<4x16xf32> to vector<4x15xf32>
    %c32_141 = arith.constant 32 : index
    %c96_142 = arith.constant 96 : index
    %132 = vector.load %arg5[%c32_141, %c96_142] : memref<48x256xf32, #tpu.memory_space<vmem>>, vector<4x15xf32>
    tpu.vector_store %arg5[%c32_141, %c96_142], %131 {strides = array<i32>} : memref<48x256xf32, #tpu.memory_space<vmem>>, vector<4x15xf32>,
    %c0_143 = arith.constant 0 : index
    %c0_144 = arith.constant 0 : index
    %c8_145 = arith.constant 8 : index
    %c0_146 = arith.constant 0 : index
    %133 = vector.load %arg1[%c0_143, %c0_144, %c8_145, %c0_146] : memref<1x4x16x16xf32, #tpu.memory_space<vmem>>, vector<1x4x1x16xf32>
    %134 = vector.shape_cast %133 : vector<1x4x1x16xf32> to vector<4x16xf32>
    %135 = vector.extract_strided_slice %134 {offsets = [0, 0], sizes = [4, 15], strides = [1, 1]} : vector<4x16xf32> to vector<4x15xf32>
    %c0_147 = arith.constant 0 : index
    %c145 = arith.constant 145 : index
    %136 = vector.load %arg5[%c0_147, %c145] : memref<48x256xf32, #tpu.memory_space<vmem>>, vector<4x15xf32>
    tpu.vector_store %arg5[%c0_147, %c145], %135 {strides = array<i32>} : memref<48x256xf32, #tpu.memory_space<vmem>>, vector<4x15xf32>,
    %c4_148 = arith.constant 4 : index
    %c144 = arith.constant 144 : index
    %137 = vector.load %arg5[%c4_148, %c144] : memref<48x256xf32, #tpu.memory_space<vmem>>, vector<4x16xf32>
    tpu.vector_store %arg5[%c4_148, %c144], %134 {strides = array<i32>} : memref<48x256xf32, #tpu.memory_space<vmem>>, vector<4x16xf32>,
    %138 = vector.extract_strided_slice %134 {offsets = [0, 1], sizes = [4, 15], strides = [1, 1]} : vector<4x16xf32> to vector<4x15xf32>
    %c8_149 = arith.constant 8 : index
    %c144_150 = arith.constant 144 : index
    %139 = vector.load %arg5[%c8_149, %c144_150] : memref<48x256xf32, #tpu.memory_space<vmem>>, vector<4x15xf32>
    tpu.vector_store %arg5[%c8_149, %c144_150], %138 {strides = array<i32>} : memref<48x256xf32, #tpu.memory_space<vmem>>, vector<4x15xf32>,
    %140 = vector.extract_strided_slice %134 {offsets = [0, 0], sizes = [4, 15], strides = [1, 1]} : vector<4x16xf32> to vector<4x15xf32>
    %c12_151 = arith.constant 12 : index
    %c129_152 = arith.constant 129 : index
    %141 = vector.load %arg5[%c12_151, %c129_152] : memref<48x256xf32, #tpu.memory_space<vmem>>, vector<4x15xf32>
    tpu.vector_store %arg5[%c12_151, %c129_152], %140 {strides = array<i32>} : memref<48x256xf32, #tpu.memory_space<vmem>>, vector<4x15xf32>,
    %c16_153 = arith.constant 16 : index
    %c128_154 = arith.constant 128 : index
    %142 = vector.load %arg5[%c16_153, %c128_154] : memref<48x256xf32, #tpu.memory_space<vmem>>, vector<4x16xf32>
    tpu.vector_store %arg5[%c16_153, %c128_154], %134 {strides = array<i32>} : memref<48x256xf32, #tpu.memory_space<vmem>>, vector<4x16xf32>,
    %143 = vector.extract_strided_slice %134 {offsets = [0, 1], sizes = [4, 15], strides = [1, 1]} : vector<4x16xf32> to vector<4x15xf32>
    %c20_155 = arith.constant 20 : index
    %c128_156 = arith.constant 128 : index
    %144 = vector.load %arg5[%c20_155, %c128_156] : memref<48x256xf32, #tpu.memory_space<vmem>>, vector<4x15xf32>
    tpu.vector_store %arg5[%c20_155, %c128_156], %143 {strides = array<i32>} : memref<48x256xf32, #tpu.memory_space<vmem>>, vector<4x15xf32>,
    %145 = vector.extract_strided_slice %134 {offsets = [0, 0], sizes = [4, 15], strides = [1, 1]} : vector<4x16xf32> to vector<4x15xf32>
    %c24_157 = arith.constant 24 : index
    %c113_158 = arith.constant 113 : index
    %146 = vector.load %arg5[%c24_157, %c113_158] : memref<48x256xf32, #tpu.memory_space<vmem>>, vector<4x15xf32>
    tpu.vector_store %arg5[%c24_157, %c113_158], %145 {strides = array<i32>} : memref<48x256xf32, #tpu.memory_space<vmem>>, vector<4x15xf32>,
    %c28_159 = arith.constant 28 : index
    %c112_160 = arith.constant 112 : index
    %147 = vector.load %arg5[%c28_159, %c112_160] : memref<48x256xf32, #tpu.memory_space<vmem>>, vector<4x16xf32>
    tpu.vector_store %arg5[%c28_159, %c112_160], %134 {strides = array<i32>} : memref<48x256xf32, #tpu.memory_space<vmem>>, vector<4x16xf32>,
    %148 = vector.extract_strided_slice %134 {offsets = [0, 1], sizes = [4, 15], strides = [1, 1]} : vector<4x16xf32> to vector<4x15xf32>
    %c32_161 = arith.constant 32 : index
    %c112_162 = arith.constant 112 : index
    %149 = vector.load %arg5[%c32_161, %c112_162] : memref<48x256xf32, #tpu.memory_space<vmem>>, vector<4x15xf32>
    tpu.vector_store %arg5[%c32_161, %c112_162], %148 {strides = array<i32>} : memref<48x256xf32, #tpu.memory_space<vmem>>, vector<4x15xf32>,
    %c0_163 = arith.constant 0 : index
    %c0_164 = arith.constant 0 : index
    %c9 = arith.constant 9 : index
    %c0_165 = arith.constant 0 : index
    %150 = vector.load %arg1[%c0_163, %c0_164, %c9, %c0_165] : memref<1x4x16x16xf32, #tpu.memory_space<vmem>>, vector<1x4x1x16xf32>
    %151 = vector.shape_cast %150 : vector<1x4x1x16xf32> to vector<4x16xf32>
    %152 = vector.extract_strided_slice %151 {offsets = [0, 0], sizes = [4, 15], strides = [1, 1]} : vector<4x16xf32> to vector<4x15xf32>
    %c0_166 = arith.constant 0 : index
    %c161 = arith.constant 161 : index
    %153 = vector.load %arg5[%c0_166, %c161] : memref<48x256xf32, #tpu.memory_space<vmem>>, vector<4x15xf32>
    tpu.vector_store %arg5[%c0_166, %c161], %152 {strides = array<i32>} : memref<48x256xf32, #tpu.memory_space<vmem>>, vector<4x15xf32>,
    %c4_167 = arith.constant 4 : index
    %c160 = arith.constant 160 : index
    %154 = vector.load %arg5[%c4_167, %c160] : memref<48x256xf32, #tpu.memory_space<vmem>>, vector<4x16xf32>
    tpu.vector_store %arg5[%c4_167, %c160], %151 {strides = array<i32>} : memref<48x256xf32, #tpu.memory_space<vmem>>, vector<4x16xf32>,
    %155 = vector.extract_strided_slice %151 {offsets = [0, 1], sizes = [4, 15], strides = [1, 1]} : vector<4x16xf32> to vector<4x15xf32>
    %c8_168 = arith.constant 8 : index
    %c160_169 = arith.constant 160 : index
    %156 = vector.load %arg5[%c8_168, %c160_169] : memref<48x256xf32, #tpu.memory_space<vmem>>, vector<4x15xf32>
    tpu.vector_store %arg5[%c8_168, %c160_169], %155 {strides = array<i32>} : memref<48x256xf32, #tpu.memory_space<vmem>>, vector<4x15xf32>,
    %157 = vector.extract_strided_slice %151 {offsets = [0, 0], sizes = [4, 15], strides = [1, 1]} : vector<4x16xf32> to vector<4x15xf32>
    %c12_170 = arith.constant 12 : index
    %c145_171 = arith.constant 145 : index
    %158 = vector.load %arg5[%c12_170, %c145_171] : memref<48x256xf32, #tpu.memory_space<vmem>>, vector<4x15xf32>
    tpu.vector_store %arg5[%c12_170, %c145_171], %157 {strides = array<i32>} : memref<48x256xf32, #tpu.memory_space<vmem>>, vector<4x15xf32>,
    %c16_172 = arith.constant 16 : index
    %c144_173 = arith.constant 144 : index
    %159 = vector.load %arg5[%c16_172, %c144_173] : memref<48x256xf32, #tpu.memory_space<vmem>>, vector<4x16xf32>
    tpu.vector_store %arg5[%c16_172, %c144_173], %151 {strides = array<i32>} : memref<48x256xf32, #tpu.memory_space<vmem>>, vector<4x16xf32>,
    %160 = vector.extract_strided_slice %151 {offsets = [0, 1], sizes = [4, 15], strides = [1, 1]} : vector<4x16xf32> to vector<4x15xf32>
    %c20_174 = arith.constant 20 : index
    %c144_175 = arith.constant 144 : index
    %161 = vector.load %arg5[%c20_174, %c144_175] : memref<48x256xf32, #tpu.memory_space<vmem>>, vector<4x15xf32>
    tpu.vector_store %arg5[%c20_174, %c144_175], %160 {strides = array<i32>} : memref<48x256xf32, #tpu.memory_space<vmem>>, vector<4x15xf32>,
    %162 = vector.extract_strided_slice %151 {offsets = [0, 0], sizes = [4, 15], strides = [1, 1]} : vector<4x16xf32> to vector<4x15xf32>
    %c24_176 = arith.constant 24 : index
    %c129_177 = arith.constant 129 : index
    %163 = vector.load %arg5[%c24_176, %c129_177] : memref<48x256xf32, #tpu.memory_space<vmem>>, vector<4x15xf32>
    tpu.vector_store %arg5[%c24_176, %c129_177], %162 {strides = array<i32>} : memref<48x256xf32, #tpu.memory_space<vmem>>, vector<4x15xf32>,
    %c28_178 = arith.constant 28 : index
    %c128_179 = arith.constant 128 : index
    %164 = vector.load %arg5[%c28_178, %c128_179] : memref<48x256xf32, #tpu.memory_space<vmem>>, vector<4x16xf32>
    tpu.vector_store %arg5[%c28_178, %c128_179], %151 {strides = array<i32>} : memref<48x256xf32, #tpu.memory_space<vmem>>, vector<4x16xf32>,
    %165 = vector.extract_strided_slice %151 {offsets = [0, 1], sizes = [4, 15], strides = [1, 1]} : vector<4x16xf32> to vector<4x15xf32>
    %c32_180 = arith.constant 32 : index
    %c128_181 = arith.constant 128 : index
    %166 = vector.load %arg5[%c32_180, %c128_181] : memref<48x256xf32, #tpu.memory_space<vmem>>, vector<4x15xf32>
    tpu.vector_store %arg5[%c32_180, %c128_181], %165 {strides = array<i32>} : memref<48x256xf32, #tpu.memory_space<vmem>>, vector<4x15xf32>,
    %c0_182 = arith.constant 0 : index
    %c0_183 = arith.constant 0 : index
    %c10 = arith.constant 10 : index
    %c0_184 = arith.constant 0 : index
    %167 = vector.load %arg1[%c0_182, %c0_183, %c10, %c0_184] : memref<1x4x16x16xf32, #tpu.memory_space<vmem>>, vector<1x4x1x16xf32>
    %168 = vector.shape_cast %167 : vector<1x4x1x16xf32> to vector<4x16xf32>
    %169 = vector.extract_strided_slice %168 {offsets = [0, 0], sizes = [4, 15], strides = [1, 1]} : vector<4x16xf32> to vector<4x15xf32>
    %c0_185 = arith.constant 0 : index
    %c177 = arith.constant 177 : index
    %170 = vector.load %arg5[%c0_185, %c177] : memref<48x256xf32, #tpu.memory_space<vmem>>, vector<4x15xf32>
    tpu.vector_store %arg5[%c0_185, %c177], %169 {strides = array<i32>} : memref<48x256xf32, #tpu.memory_space<vmem>>, vector<4x15xf32>,
    %c4_186 = arith.constant 4 : index
    %c176 = arith.constant 176 : index
    %171 = vector.load %arg5[%c4_186, %c176] : memref<48x256xf32, #tpu.memory_space<vmem>>, vector<4x16xf32>
    tpu.vector_store %arg5[%c4_186, %c176], %168 {strides = array<i32>} : memref<48x256xf32, #tpu.memory_space<vmem>>, vector<4x16xf32>,
    %172 = vector.extract_strided_slice %168 {offsets = [0, 1], sizes = [4, 15], strides = [1, 1]} : vector<4x16xf32> to vector<4x15xf32>
    %c8_187 = arith.constant 8 : index
    %c176_188 = arith.constant 176 : index
    %173 = vector.load %arg5[%c8_187, %c176_188] : memref<48x256xf32, #tpu.memory_space<vmem>>, vector<4x15xf32>
    tpu.vector_store %arg5[%c8_187, %c176_188], %172 {strides = array<i32>} : memref<48x256xf32, #tpu.memory_space<vmem>>, vector<4x15xf32>,
    %174 = vector.extract_strided_slice %168 {offsets = [0, 0], sizes = [4, 15], strides = [1, 1]} : vector<4x16xf32> to vector<4x15xf32>
    %c12_189 = arith.constant 12 : index
    %c161_190 = arith.constant 161 : index
    %175 = vector.load %arg5[%c12_189, %c161_190] : memref<48x256xf32, #tpu.memory_space<vmem>>, vector<4x15xf32>
    tpu.vector_store %arg5[%c12_189, %c161_190], %174 {strides = array<i32>} : memref<48x256xf32, #tpu.memory_space<vmem>>, vector<4x15xf32>,
    %c16_191 = arith.constant 16 : index
    %c160_192 = arith.constant 160 : index
    %176 = vector.load %arg5[%c16_191, %c160_192] : memref<48x256xf32, #tpu.memory_space<vmem>>, vector<4x16xf32>
    tpu.vector_store %arg5[%c16_191, %c160_192], %168 {strides = array<i32>} : memref<48x256xf32, #tpu.memory_space<vmem>>, vector<4x16xf32>,
    %177 = vector.extract_strided_slice %168 {offsets = [0, 1], sizes = [4, 15], strides = [1, 1]} : vector<4x16xf32> to vector<4x15xf32>
    %c20_193 = arith.constant 20 : index
    %c160_194 = arith.constant 160 : index
    %178 = vector.load %arg5[%c20_193, %c160_194] : memref<48x256xf32, #tpu.memory_space<vmem>>, vector<4x15xf32>
    tpu.vector_store %arg5[%c20_193, %c160_194], %177 {strides = array<i32>} : memref<48x256xf32, #tpu.memory_space<vmem>>, vector<4x15xf32>,
    %179 = vector.extract_strided_slice %168 {offsets = [0, 0], sizes = [4, 15], strides = [1, 1]} : vector<4x16xf32> to vector<4x15xf32>
    %c24_195 = arith.constant 24 : index
    %c145_196 = arith.constant 145 : index
    %180 = vector.load %arg5[%c24_195, %c145_196] : memref<48x256xf32, #tpu.memory_space<vmem>>, vector<4x15xf32>
    tpu.vector_store %arg5[%c24_195, %c145_196], %179 {strides = array<i32>} : memref<48x256xf32, #tpu.memory_space<vmem>>, vector<4x15xf32>,
    %c28_197 = arith.constant 28 : index
    %c144_198 = arith.constant 144 : index
    %181 = vector.load %arg5[%c28_197, %c144_198] : memref<48x256xf32, #tpu.memory_space<vmem>>, vector<4x16xf32>
    tpu.vector_store %arg5[%c28_197, %c144_198], %168 {strides = array<i32>} : memref<48x256xf32, #tpu.memory_space<vmem>>, vector<4x16xf32>,
    %182 = vector.extract_strided_slice %168 {offsets = [0, 1], sizes = [4, 15], strides = [1, 1]} : vector<4x16xf32> to vector<4x15xf32>
    %c32_199 = arith.constant 32 : index
    %c144_200 = arith.constant 144 : index
    %183 = vector.load %arg5[%c32_199, %c144_200] : memref<48x256xf32, #tpu.memory_space<vmem>>, vector<4x15xf32>
    tpu.vector_store %arg5[%c32_199, %c144_200], %182 {strides = array<i32>} : memref<48x256xf32, #tpu.memory_space<vmem>>, vector<4x15xf32>,
    %c0_201 = arith.constant 0 : index
    %c0_202 = arith.constant 0 : index
    %c11 = arith.constant 11 : index
    %c0_203 = arith.constant 0 : index
    %184 = vector.load %arg1[%c0_201, %c0_202, %c11, %c0_203] : memref<1x4x16x16xf32, #tpu.memory_space<vmem>>, vector<1x4x1x16xf32>
    %185 = vector.shape_cast %184 : vector<1x4x1x16xf32> to vector<4x16xf32>
    %186 = vector.extract_strided_slice %185 {offsets = [0, 0], sizes = [4, 15], strides = [1, 1]} : vector<4x16xf32> to vector<4x15xf32>
    %c0_204 = arith.constant 0 : index
    %c193 = arith.constant 193 : index
    %187 = vector.load %arg5[%c0_204, %c193] : memref<48x256xf32, #tpu.memory_space<vmem>>, vector<4x15xf32>
    tpu.vector_store %arg5[%c0_204, %c193], %186 {strides = array<i32>} : memref<48x256xf32, #tpu.memory_space<vmem>>, vector<4x15xf32>,
    %c4_205 = arith.constant 4 : index
    %c192 = arith.constant 192 : index
    %188 = vector.load %arg5[%c4_205, %c192] : memref<48x256xf32, #tpu.memory_space<vmem>>, vector<4x16xf32>
    tpu.vector_store %arg5[%c4_205, %c192], %185 {strides = array<i32>} : memref<48x256xf32, #tpu.memory_space<vmem>>, vector<4x16xf32>,
    %189 = vector.extract_strided_slice %185 {offsets = [0, 1], sizes = [4, 15], strides = [1, 1]} : vector<4x16xf32> to vector<4x15xf32>
    %c8_206 = arith.constant 8 : index
    %c192_207 = arith.constant 192 : index
    %190 = vector.load %arg5[%c8_206, %c192_207] : memref<48x256xf32, #tpu.memory_space<vmem>>, vector<4x15xf32>
    tpu.vector_store %arg5[%c8_206, %c192_207], %189 {strides = array<i32>} : memref<48x256xf32, #tpu.memory_space<vmem>>, vector<4x15xf32>,
    %191 = vector.extract_strided_slice %185 {offsets = [0, 0], sizes = [4, 15], strides = [1, 1]} : vector<4x16xf32> to vector<4x15xf32>
    %c12_208 = arith.constant 12 : index
    %c177_209 = arith.constant 177 : index
    %192 = vector.load %arg5[%c12_208, %c177_209] : memref<48x256xf32, #tpu.memory_space<vmem>>, vector<4x15xf32>
    tpu.vector_store %arg5[%c12_208, %c177_209], %191 {strides = array<i32>} : memref<48x256xf32, #tpu.memory_space<vmem>>, vector<4x15xf32>,
    %c16_210 = arith.constant 16 : index
    %c176_211 = arith.constant 176 : index
    %193 = vector.load %arg5[%c16_210, %c176_211] : memref<48x256xf32, #tpu.memory_space<vmem>>, vector<4x16xf32>
    tpu.vector_store %arg5[%c16_210, %c176_211], %185 {strides = array<i32>} : memref<48x256xf32, #tpu.memory_space<vmem>>, vector<4x16xf32>,
    %194 = vector.extract_strided_slice %185 {offsets = [0, 1], sizes = [4, 15], strides = [1, 1]} : vector<4x16xf32> to vector<4x15xf32>
    %c20_212 = arith.constant 20 : index
    %c176_213 = arith.constant 176 : index
    %195 = vector.load %arg5[%c20_212, %c176_213] : memref<48x256xf32, #tpu.memory_space<vmem>>, vector<4x15xf32>
    tpu.vector_store %arg5[%c20_212, %c176_213], %194 {strides = array<i32>} : memref<48x256xf32, #tpu.memory_space<vmem>>, vector<4x15xf32>,
    %196 = vector.extract_strided_slice %185 {offsets = [0, 0], sizes = [4, 15], strides = [1, 1]} : vector<4x16xf32> to vector<4x15xf32>
    %c24_214 = arith.constant 24 : index
    %c161_215 = arith.constant 161 : index
    %197 = vector.load %arg5[%c24_214, %c161_215] : memref<48x256xf32, #tpu.memory_space<vmem>>, vector<4x15xf32>
    tpu.vector_store %arg5[%c24_214, %c161_215], %196 {strides = array<i32>} : memref<48x256xf32, #tpu.memory_space<vmem>>, vector<4x15xf32>,
    %c28_216 = arith.constant 28 : index
    %c160_217 = arith.constant 160 : index
    %198 = vector.load %arg5[%c28_216, %c160_217] : memref<48x256xf32, #tpu.memory_space<vmem>>, vector<4x16xf32>
    tpu.vector_store %arg5[%c28_216, %c160_217], %185 {strides = array<i32>} : memref<48x256xf32, #tpu.memory_space<vmem>>, vector<4x16xf32>,
    %199 = vector.extract_strided_slice %185 {offsets = [0, 1], sizes = [4, 15], strides = [1, 1]} : vector<4x16xf32> to vector<4x15xf32>
    %c32_218 = arith.constant 32 : index
    %c160_219 = arith.constant 160 : index
    %200 = vector.load %arg5[%c32_218, %c160_219] : memref<48x256xf32, #tpu.memory_space<vmem>>, vector<4x15xf32>
    tpu.vector_store %arg5[%c32_218, %c160_219], %199 {strides = array<i32>} : memref<48x256xf32, #tpu.memory_space<vmem>>, vector<4x15xf32>,
    %c0_220 = arith.constant 0 : index
    %c0_221 = arith.constant 0 : index
    %c12_222 = arith.constant 12 : index
    %c0_223 = arith.constant 0 : index
    %201 = vector.load %arg1[%c0_220, %c0_221, %c12_222, %c0_223] : memref<1x4x16x16xf32, #tpu.memory_space<vmem>>, vector<1x4x1x16xf32>
    %202 = vector.shape_cast %201 : vector<1x4x1x16xf32> to vector<4x16xf32>
    %203 = vector.extract_strided_slice %202 {offsets = [0, 0], sizes = [4, 15], strides = [1, 1]} : vector<4x16xf32> to vector<4x15xf32>
    %c0_224 = arith.constant 0 : index
    %c209 = arith.constant 209 : index
    %204 = vector.load %arg5[%c0_224, %c209] : memref<48x256xf32, #tpu.memory_space<vmem>>, vector<4x15xf32>
    tpu.vector_store %arg5[%c0_224, %c209], %203 {strides = array<i32>} : memref<48x256xf32, #tpu.memory_space<vmem>>, vector<4x15xf32>,
    %c4_225 = arith.constant 4 : index
    %c208 = arith.constant 208 : index
    %205 = vector.load %arg5[%c4_225, %c208] : memref<48x256xf32, #tpu.memory_space<vmem>>, vector<4x16xf32>
    tpu.vector_store %arg5[%c4_225, %c208], %202 {strides = array<i32>} : memref<48x256xf32, #tpu.memory_space<vmem>>, vector<4x16xf32>,
    %206 = vector.extract_strided_slice %202 {offsets = [0, 1], sizes = [4, 15], strides = [1, 1]} : vector<4x16xf32> to vector<4x15xf32>
    %c8_226 = arith.constant 8 : index
    %c208_227 = arith.constant 208 : index
    %207 = vector.load %arg5[%c8_226, %c208_227] : memref<48x256xf32, #tpu.memory_space<vmem>>, vector<4x15xf32>
    tpu.vector_store %arg5[%c8_226, %c208_227], %206 {strides = array<i32>} : memref<48x256xf32, #tpu.memory_space<vmem>>, vector<4x15xf32>,
    %208 = vector.extract_strided_slice %202 {offsets = [0, 0], sizes = [4, 15], strides = [1, 1]} : vector<4x16xf32> to vector<4x15xf32>
    %c12_228 = arith.constant 12 : index
    %c193_229 = arith.constant 193 : index
    %209 = vector.load %arg5[%c12_228, %c193_229] : memref<48x256xf32, #tpu.memory_space<vmem>>, vector<4x15xf32>
    tpu.vector_store %arg5[%c12_228, %c193_229], %208 {strides = array<i32>} : memref<48x256xf32, #tpu.memory_space<vmem>>, vector<4x15xf32>,
    %c16_230 = arith.constant 16 : index
    %c192_231 = arith.constant 192 : index
    %210 = vector.load %arg5[%c16_230, %c192_231] : memref<48x256xf32, #tpu.memory_space<vmem>>, vector<4x16xf32>
    tpu.vector_store %arg5[%c16_230, %c192_231], %202 {strides = array<i32>} : memref<48x256xf32, #tpu.memory_space<vmem>>, vector<4x16xf32>,
    %211 = vector.extract_strided_slice %202 {offsets = [0, 1], sizes = [4, 15], strides = [1, 1]} : vector<4x16xf32> to vector<4x15xf32>
    %c20_232 = arith.constant 20 : index
    %c192_233 = arith.constant 192 : index
    %212 = vector.load %arg5[%c20_232, %c192_233] : memref<48x256xf32, #tpu.memory_space<vmem>>, vector<4x15xf32>
    tpu.vector_store %arg5[%c20_232, %c192_233], %211 {strides = array<i32>} : memref<48x256xf32, #tpu.memory_space<vmem>>, vector<4x15xf32>,
    %213 = vector.extract_strided_slice %202 {offsets = [0, 0], sizes = [4, 15], strides = [1, 1]} : vector<4x16xf32> to vector<4x15xf32>
    %c24_234 = arith.constant 24 : index
    %c177_235 = arith.constant 177 : index
    %214 = vector.load %arg5[%c24_234, %c177_235] : memref<48x256xf32, #tpu.memory_space<vmem>>, vector<4x15xf32>
    tpu.vector_store %arg5[%c24_234, %c177_235], %213 {strides = array<i32>} : memref<48x256xf32, #tpu.memory_space<vmem>>, vector<4x15xf32>,
    %c28_236 = arith.constant 28 : index
    %c176_237 = arith.constant 176 : index
    %215 = vector.load %arg5[%c28_236, %c176_237] : memref<48x256xf32, #tpu.memory_space<vmem>>, vector<4x16xf32>
    tpu.vector_store %arg5[%c28_236, %c176_237], %202 {strides = array<i32>} : memref<48x256xf32, #tpu.memory_space<vmem>>, vector<4x16xf32>,
    %216 = vector.extract_strided_slice %202 {offsets = [0, 1], sizes = [4, 15], strides = [1, 1]} : vector<4x16xf32> to vector<4x15xf32>
    %c32_238 = arith.constant 32 : index
    %c176_239 = arith.constant 176 : index
    %217 = vector.load %arg5[%c32_238, %c176_239] : memref<48x256xf32, #tpu.memory_space<vmem>>, vector<4x15xf32>
    tpu.vector_store %arg5[%c32_238, %c176_239], %216 {strides = array<i32>} : memref<48x256xf32, #tpu.memory_space<vmem>>, vector<4x15xf32>,
    %c0_240 = arith.constant 0 : index
    %c0_241 = arith.constant 0 : index
    %c13 = arith.constant 13 : index
    %c0_242 = arith.constant 0 : index
    %218 = vector.load %arg1[%c0_240, %c0_241, %c13, %c0_242] : memref<1x4x16x16xf32, #tpu.memory_space<vmem>>, vector<1x4x1x16xf32>
    %219 = vector.shape_cast %218 : vector<1x4x1x16xf32> to vector<4x16xf32>
    %220 = vector.extract_strided_slice %219 {offsets = [0, 0], sizes = [4, 15], strides = [1, 1]} : vector<4x16xf32> to vector<4x15xf32>
    %c0_243 = arith.constant 0 : index
    %c225 = arith.constant 225 : index
    %221 = vector.load %arg5[%c0_243, %c225] : memref<48x256xf32, #tpu.memory_space<vmem>>, vector<4x15xf32>
    tpu.vector_store %arg5[%c0_243, %c225], %220 {strides = array<i32>} : memref<48x256xf32, #tpu.memory_space<vmem>>, vector<4x15xf32>,
    %c4_244 = arith.constant 4 : index
    %c224 = arith.constant 224 : index
    %222 = vector.load %arg5[%c4_244, %c224] : memref<48x256xf32, #tpu.memory_space<vmem>>, vector<4x16xf32>
    tpu.vector_store %arg5[%c4_244, %c224], %219 {strides = array<i32>} : memref<48x256xf32, #tpu.memory_space<vmem>>, vector<4x16xf32>,
    %223 = vector.extract_strided_slice %219 {offsets = [0, 1], sizes = [4, 15], strides = [1, 1]} : vector<4x16xf32> to vector<4x15xf32>
    %c8_245 = arith.constant 8 : index
    %c224_246 = arith.constant 224 : index
    %224 = vector.load %arg5[%c8_245, %c224_246] : memref<48x256xf32, #tpu.memory_space<vmem>>, vector<4x15xf32>
    tpu.vector_store %arg5[%c8_245, %c224_246], %223 {strides = array<i32>} : memref<48x256xf32, #tpu.memory_space<vmem>>, vector<4x15xf32>,
    %225 = vector.extract_strided_slice %219 {offsets = [0, 0], sizes = [4, 15], strides = [1, 1]} : vector<4x16xf32> to vector<4x15xf32>
    %c12_247 = arith.constant 12 : index
    %c209_248 = arith.constant 209 : index
    %226 = vector.load %arg5[%c12_247, %c209_248] : memref<48x256xf32, #tpu.memory_space<vmem>>, vector<4x15xf32>
    tpu.vector_store %arg5[%c12_247, %c209_248], %225 {strides = array<i32>} : memref<48x256xf32, #tpu.memory_space<vmem>>, vector<4x15xf32>,
    %c16_249 = arith.constant 16 : index
    %c208_250 = arith.constant 208 : index
    %227 = vector.load %arg5[%c16_249, %c208_250] : memref<48x256xf32, #tpu.memory_space<vmem>>, vector<4x16xf32>
    tpu.vector_store %arg5[%c16_249, %c208_250], %219 {strides = array<i32>} : memref<48x256xf32, #tpu.memory_space<vmem>>, vector<4x16xf32>,
    %228 = vector.extract_strided_slice %219 {offsets = [0, 1], sizes = [4, 15], strides = [1, 1]} : vector<4x16xf32> to vector<4x15xf32>
    %c20_251 = arith.constant 20 : index
    %c208_252 = arith.constant 208 : index
    %229 = vector.load %arg5[%c20_251, %c208_252] : memref<48x256xf32, #tpu.memory_space<vmem>>, vector<4x15xf32>
    tpu.vector_store %arg5[%c20_251, %c208_252], %228 {strides = array<i32>} : memref<48x256xf32, #tpu.memory_space<vmem>>, vector<4x15xf32>,
    %230 = vector.extract_strided_slice %219 {offsets = [0, 0], sizes = [4, 15], strides = [1, 1]} : vector<4x16xf32> to vector<4x15xf32>
    %c24_253 = arith.constant 24 : index
    %c193_254 = arith.constant 193 : index
    %231 = vector.load %arg5[%c24_253, %c193_254] : memref<48x256xf32, #tpu.memory_space<vmem>>, vector<4x15xf32>
    tpu.vector_store %arg5[%c24_253, %c193_254], %230 {strides = array<i32>} : memref<48x256xf32, #tpu.memory_space<vmem>>, vector<4x15xf32>,
    %c28_255 = arith.constant 28 : index
    %c192_256 = arith.constant 192 : index
    %232 = vector.load %arg5[%c28_255, %c192_256] : memref<48x256xf32, #tpu.memory_space<vmem>>, vector<4x16xf32>
    tpu.vector_store %arg5[%c28_255, %c192_256], %219 {strides = array<i32>} : memref<48x256xf32, #tpu.memory_space<vmem>>, vector<4x16xf32>,
    %233 = vector.extract_strided_slice %219 {offsets = [0, 1], sizes = [4, 15], strides = [1, 1]} : vector<4x16xf32> to vector<4x15xf32>
    %c32_257 = arith.constant 32 : index
    %c192_258 = arith.constant 192 : index
    %234 = vector.load %arg5[%c32_257, %c192_258] : memref<48x256xf32, #tpu.memory_space<vmem>>, vector<4x15xf32>
    tpu.vector_store %arg5[%c32_257, %c192_258], %233 {strides = array<i32>} : memref<48x256xf32, #tpu.memory_space<vmem>>, vector<4x15xf32>,
    %c0_259 = arith.constant 0 : index
    %c0_260 = arith.constant 0 : index
    %c14 = arith.constant 14 : index
    %c0_261 = arith.constant 0 : index
    %235 = vector.load %arg1[%c0_259, %c0_260, %c14, %c0_261] : memref<1x4x16x16xf32, #tpu.memory_space<vmem>>, vector<1x4x1x16xf32>
    %236 = vector.shape_cast %235 : vector<1x4x1x16xf32> to vector<4x16xf32>
    %237 = vector.extract_strided_slice %236 {offsets = [0, 0], sizes = [4, 15], strides = [1, 1]} : vector<4x16xf32> to vector<4x15xf32>
    %c0_262 = arith.constant 0 : index
    %c241 = arith.constant 241 : index
    %238 = vector.load %arg5[%c0_262, %c241] : memref<48x256xf32, #tpu.memory_space<vmem>>, vector<4x15xf32>
    tpu.vector_store %arg5[%c0_262, %c241], %237 {strides = array<i32>} : memref<48x256xf32, #tpu.memory_space<vmem>>, vector<4x15xf32>,
    %c4_263 = arith.constant 4 : index
    %c240 = arith.constant 240 : index
    %239 = vector.load %arg5[%c4_263, %c240] : memref<48x256xf32, #tpu.memory_space<vmem>>, vector<4x16xf32>
    tpu.vector_store %arg5[%c4_263, %c240], %236 {strides = array<i32>} : memref<48x256xf32, #tpu.memory_space<vmem>>, vector<4x16xf32>,
    %240 = vector.extract_strided_slice %236 {offsets = [0, 1], sizes = [4, 15], strides = [1, 1]} : vector<4x16xf32> to vector<4x15xf32>
    %c8_264 = arith.constant 8 : index
    %c240_265 = arith.constant 240 : index
    %241 = vector.load %arg5[%c8_264, %c240_265] : memref<48x256xf32, #tpu.memory_space<vmem>>, vector<4x15xf32>
    tpu.vector_store %arg5[%c8_264, %c240_265], %240 {strides = array<i32>} : memref<48x256xf32, #tpu.memory_space<vmem>>, vector<4x15xf32>,
    %242 = vector.extract_strided_slice %236 {offsets = [0, 0], sizes = [4, 15], strides = [1, 1]} : vector<4x16xf32> to vector<4x15xf32>
    %c12_266 = arith.constant 12 : index
    %c225_267 = arith.constant 225 : index
    %243 = vector.load %arg5[%c12_266, %c225_267] : memref<48x256xf32, #tpu.memory_space<vmem>>, vector<4x15xf32>
    tpu.vector_store %arg5[%c12_266, %c225_267], %242 {strides = array<i32>} : memref<48x256xf32, #tpu.memory_space<vmem>>, vector<4x15xf32>,
    %c16_268 = arith.constant 16 : index
    %c224_269 = arith.constant 224 : index
    %244 = vector.load %arg5[%c16_268, %c224_269] : memref<48x256xf32, #tpu.memory_space<vmem>>, vector<4x16xf32>
    tpu.vector_store %arg5[%c16_268, %c224_269], %236 {strides = array<i32>} : memref<48x256xf32, #tpu.memory_space<vmem>>, vector<4x16xf32>,
    %245 = vector.extract_strided_slice %236 {offsets = [0, 1], sizes = [4, 15], strides = [1, 1]} : vector<4x16xf32> to vector<4x15xf32>
    %c20_270 = arith.constant 20 : index
    %c224_271 = arith.constant 224 : index
    %246 = vector.load %arg5[%c20_270, %c224_271] : memref<48x256xf32, #tpu.memory_space<vmem>>, vector<4x15xf32>
    tpu.vector_store %arg5[%c20_270, %c224_271], %245 {strides = array<i32>} : memref<48x256xf32, #tpu.memory_space<vmem>>, vector<4x15xf32>,
    %247 = vector.extract_strided_slice %236 {offsets = [0, 0], sizes = [4, 15], strides = [1, 1]} : vector<4x16xf32> to vector<4x15xf32>
    %c24_272 = arith.constant 24 : index
    %c209_273 = arith.constant 209 : index
    %248 = vector.load %arg5[%c24_272, %c209_273] : memref<48x256xf32, #tpu.memory_space<vmem>>, vector<4x15xf32>
    tpu.vector_store %arg5[%c24_272, %c209_273], %247 {strides = array<i32>} : memref<48x256xf32, #tpu.memory_space<vmem>>, vector<4x15xf32>,
    %c28_274 = arith.constant 28 : index
    %c208_275 = arith.constant 208 : index
    %249 = vector.load %arg5[%c28_274, %c208_275] : memref<48x256xf32, #tpu.memory_space<vmem>>, vector<4x16xf32>
    tpu.vector_store %arg5[%c28_274, %c208_275], %236 {strides = array<i32>} : memref<48x256xf32, #tpu.memory_space<vmem>>, vector<4x16xf32>,
    %250 = vector.extract_strided_slice %236 {offsets = [0, 1], sizes = [4, 15], strides = [1, 1]} : vector<4x16xf32> to vector<4x15xf32>
    %c32_276 = arith.constant 32 : index
    %c208_277 = arith.constant 208 : index
    %251 = vector.load %arg5[%c32_276, %c208_277] : memref<48x256xf32, #tpu.memory_space<vmem>>, vector<4x15xf32>
    tpu.vector_store %arg5[%c32_276, %c208_277], %250 {strides = array<i32>} : memref<48x256xf32, #tpu.memory_space<vmem>>, vector<4x15xf32>,
    %c0_278 = arith.constant 0 : index
    %c0_279 = arith.constant 0 : index
    %c15 = arith.constant 15 : index
    %c0_280 = arith.constant 0 : index
    %252 = vector.load %arg1[%c0_278, %c0_279, %c15, %c0_280] : memref<1x4x16x16xf32, #tpu.memory_space<vmem>>, vector<1x4x1x16xf32>
    %253 = vector.shape_cast %252 : vector<1x4x1x16xf32> to vector<4x16xf32>
    %254 = vector.extract_strided_slice %253 {offsets = [0, 0], sizes = [4, 15], strides = [1, 1]} : vector<4x16xf32> to vector<4x15xf32>
    %c12_281 = arith.constant 12 : index
    %c241_282 = arith.constant 241 : index
    %255 = vector.load %arg5[%c12_281, %c241_282] : memref<48x256xf32, #tpu.memory_space<vmem>>, vector<4x15xf32>
    tpu.vector_store %arg5[%c12_281, %c241_282], %254 {strides = array<i32>} : memref<48x256xf32, #tpu.memory_space<vmem>>, vector<4x15xf32>,
    %c16_283 = arith.constant 16 : index
    %c240_284 = arith.constant 240 : index
    %256 = vector.load %arg5[%c16_283, %c240_284] : memref<48x256xf32, #tpu.memory_space<vmem>>, vector<4x16xf32>
    tpu.vector_store %arg5[%c16_283, %c240_284], %253 {strides = array<i32>} : memref<48x256xf32, #tpu.memory_space<vmem>>, vector<4x16xf32>,
    %257 = vector.extract_strided_slice %253 {offsets = [0, 1], sizes = [4, 15], strides = [1, 1]} : vector<4x16xf32> to vector<4x15xf32>
    %c20_285 = arith.constant 20 : index
    %c240_286 = arith.constant 240 : index
    %258 = vector.load %arg5[%c20_285, %c240_286] : memref<48x256xf32, #tpu.memory_space<vmem>>, vector<4x15xf32>
    tpu.vector_store %arg5[%c20_285, %c240_286], %257 {strides = array<i32>} : memref<48x256xf32, #tpu.memory_space<vmem>>, vector<4x15xf32>,
    %259 = vector.extract_strided_slice %253 {offsets = [0, 0], sizes = [4, 15], strides = [1, 1]} : vector<4x16xf32> to vector<4x15xf32>
    %c24_287 = arith.constant 24 : index
    %c225_288 = arith.constant 225 : index
    %260 = vector.load %arg5[%c24_287, %c225_288] : memref<48x256xf32, #tpu.memory_space<vmem>>, vector<4x15xf32>
    tpu.vector_store %arg5[%c24_287, %c225_288], %259 {strides = array<i32>} : memref<48x256xf32, #tpu.memory_space<vmem>>, vector<4x15xf32>,
    %c28_289 = arith.constant 28 : index
    %c224_290 = arith.constant 224 : index
    %261 = vector.load %arg5[%c28_289, %c224_290] : memref<48x256xf32, #tpu.memory_space<vmem>>, vector<4x16xf32>
    tpu.vector_store %arg5[%c28_289, %c224_290], %253 {strides = array<i32>} : memref<48x256xf32, #tpu.memory_space<vmem>>, vector<4x16xf32>,
    %262 = vector.extract_strided_slice %253 {offsets = [0, 1], sizes = [4, 15], strides = [1, 1]} : vector<4x16xf32> to vector<4x15xf32>
    %c32_291 = arith.constant 32 : index
    %c224_292 = arith.constant 224 : index
    %263 = vector.load %arg5[%c32_291, %c224_292] : memref<48x256xf32, #tpu.memory_space<vmem>>, vector<4x15xf32>
    tpu.vector_store %arg5[%c32_291, %c224_292], %262 {strides = array<i32>} : memref<48x256xf32, #tpu.memory_space<vmem>>, vector<4x15xf32>,
    %c0_293 = arith.constant 0 : index
    %c0_294 = arith.constant 0 : index
    %264 = vector.load %arg5[%c0_293, %c0_294] : memref<48x256xf32, #tpu.memory_space<vmem>>, vector<48x256xf32>
    %265 = arith.truncf %264 : vector<48x256xf32> to vector<48x256xbf16>
    %c0_295 = arith.constant 0 : index
    %c0_296 = arith.constant 0 : index
    %266 = vector.load %arg2[%c0_295, %c0_296] : memref<8x48xbf16, #tpu.memory_space<vmem>>, vector<8x48xbf16>
    %cst_297 = arith.constant dense<0.000000e+00> : vector<8x256xf32>
    %267 = tpu.matmul %266, %265, %cst_297 {dimension_numbers = #tpu.dot_dimension_numbers<[1], [0], [0], [1], [0, 0, 1, 1], [], []>} : vector<8x48xbf16>, vector<48x256xbf16>, vector<8x256xf32> -> vector<8x256xf32>
    %c0_298 = arith.constant 0 : index
    %c0_299 = arith.constant 0 : index
    %268 = vector.load %arg3[%c0_298, %c0_299] : memref<8x1xf32, #tpu.memory_space<vmem>>, vector<8x1xf32>
    %269 = vector.broadcast %268 : vector<8x1xf32> to vector<8x256xf32>
    %270 = arith.addf %267, %269 : vector<8x256xf32>
    %cst_300 = arith.constant 0.000000e+00 : f32
    %271 = vector.broadcast %cst_300 : f32 to vector<8x256xf32>
    %272 = arith.maximumf %270, %271 : vector<8x256xf32>
    %c0_301 = arith.constant 0 : index
    %c0_302 = arith.constant 0 : index
    %c0_303 = arith.constant 0 : index
    %273 = vector.load %arg4[%c0_301, %c0_302, %c0_303] : memref<1x8x256xf32, #tpu.memory_space<vmem>>, vector<1x8x256xf32>
    %274 = vector.shape_cast %273 : vector<1x8x256xf32> to vector<8x256xf32>
    %275 = vector.shape_cast %272 : vector<8x256xf32> to vector<1x8x256xf32>
    tpu.vector_store %arg4[%c0_301, %c0_302, %c0_303], %275 {strides = array<i32>} : memref<1x8x256xf32, #tpu.memory_space<vmem>>, vector<1x8x256xf32>,
    return
  }
  func.func @transform_0(%arg0: i32) -> (i32, i32, i32, i32) {
    %c0_i32 = arith.constant 0 : i32
    %c0_i32_0 = arith.constant 0 : i32
    %c0_i32_1 = arith.constant 0 : i32
    %c0_i32_2 = arith.constant 0 : i32
    return %arg0, %c0_i32, %c0_i32_0, %c0_i32_1 : i32, i32, i32, i32
  }
  func.func @transform_1(%arg0: i32) -> (i32, i32) {
    %c0_i32 = arith.constant 0 : i32
    %c0_i32_0 = arith.constant 0 : i32
    %c0_i32_1 = arith.constant 0 : i32
    return %c0_i32, %c0_i32_0 : i32, i32
  }
  func.func @transform_2(%arg0: i32) -> (i32, i32) {
    %c0_i32 = arith.constant 0 : i32
    %c0_i32_0 = arith.constant 0 : i32
    %c0_i32_1 = arith.constant 0 : i32
    return %c0_i32, %c0_i32_0 : i32, i32
  }
  func.func @transform_3(%arg0: i32) -> (i32, i32, i32) {
    %c0_i32 = arith.constant 0 : i32
    %c0_i32_0 = arith.constant 0 : i32
    %c0_i32_1 = arith.constant 0 : i32
    return %arg0, %c0_i32, %c0_i32_0 : i32, i32, i32
  }
}

</mosaic_0001>

<bundles_post_ra>
// kernel: basic_conv2d_forward.1
= control target key start
LH: loop header
LB: loop body
LE: loop exit
PB: predicated region body
PF: predicated region fallthrough
CT: control target
= control target key end

     0   :  { %s1334_s12 = smov 0   ;;  %s2043_s0 = inlined_call_operand.vmem [shape: f32[2,4,16,16], index: 0, kind: input, shape index: {}]   ;;  %s2044_s1 = inlined_call_operand.vmem [shape: bf16[8,48], index: 1, kind: input, shape index: {}]   ;;  %s2045_s2 = inlined_call_operand.vmem [shape: f32[8,1], index: 2, kind: input, shape index: {}]   ;;  %s2046_s3 = inlined_call_operand.vmem [shape: f32[2,8,256], index: 3, kind: output, shape index: {}]  }
   0x1 LB: > { %s1230_s13 = sadd.s32 4294967295, %s1287_s12   ;;  %p1234_p0 = scmp.ge.s32.totalorder %s1287_s12, 1  ;;  %s1287_s12 = sphi %s1334_s12, %s13_s12  }
   0x2   : > { %p137_p1 = scmp.lt.s32.totalorder %s1287_s12, 3 }
   0x4   : > { %p138_p2 = pnand %p1234_p0, %p137_p1 }
   0x5   : > { %p161_p3 = scmp.lt.s32.totalorder (!%p138_p2), %s1230_s13, 1  ;;  %s1289_s18 = smov (!%p138_p2), 15  }
   0x6   : > { %141 = sbr.rel (%p138_p2) target bundleno = 634 (0x27a), region = 32  ;;  %s1290_s19 = smov (!%p138_p2), 17  }
   0x7   : > { %s1291_s20 = smov (!%p138_p2), 127   ;;  %s1292_s21 = smov (!%p138_p2), 1  }
   0x8   : > { %s1293_s22 = smov (!%p138_p2), 16   ;;  %s1294_s23 = smov (!%p138_p2), 33  }
   0x9   : > { %s1295_s24 = smov (!%p138_p2), 31   ;;  %s1296_s25 = smov (!%p138_p2), 32  }
   0xa   : > { %s1297_s26 = smov (!%p138_p2), 49   ;;  %s1298_s27 = smov (!%p138_p2), 48  }
   0xb   : > { %s2141_s13 = smov (!%p161_p3, %s1230_s13), 1  ;;  %vm193_vm0 = vcmask 1041409   ;;  %vm196_vm1 = vcmask 1042434   ;;  %vm208_vm2 = vcmask 1045509   ;;  %vm211_vm3 = vcmask 1046534   ;;  %s1299_s28 = smov 47  }
   0xc   : > { %s1243_s14 = sshll.u32 %s2141_s13, 6  ;;  %vm199_vm4 = vcmask 1043459   ;;  %vm214_vm5 = vcmask 1047559   ;;  %s1300_s29 = smov 65   ;;  %vm2049_vm6 = vcmask 121860   ;;  %vm232_vm7 = vcmask 125952  }
   0xd   : > { %s1348_s17 = scalar_lea.vmem %s2043_s0, %s1243_s14  ;;  %s1301_s30 = smov 64   ;;  %vm2067_vm8 = vcmask 248960   ;;  %vm2065_vm9 = vcmask 257160   ;;  %vm2051_vm10 = vcmask 388360   ;;  %vm2050_vm11 = vcmask 125960  }
   0xe   : > { %v184_v0 = vld [vmem:[%s1348_s17] sm:$0x1]  ;;  %v185_v1 = vld [vmem:[%s1348_s17 + $0x10] sm:$0x1]  ;;  %v240_v13 = vld [vmem:[%s1348_s17 + $0x11] sm:$0x1] }
   0xf   : > { %v186_v2 = vld [vmem:[%s1348_s17 + $0x20] sm:$0x1]  ;;  %v187_v3 = vld [vmem:[%s1348_s17 + $0x30] sm:$0x1]  ;;  %v192_v4 = vrot.slane %v185_v1, 7  ;;  %v206_v6 = vrot.slane %v184_v0, 4 }
  0x10   : > { %v195_v5 = vrot.slane %v186_v2, 6  ;;  %v207_v7 = vrot.slane %v185_v1, 3  ;;  %v198_v8 = vrot.slane %v187_v3, 5  ;;  %v210_v9 = vrot.slane %v186_v2, 2  ;;  %v241_v16 = vld [vmem:[%s1348_s17 + $0x21] sm:$0x1] }
  0x11   : > { %v213_v10 = vrot.slane %v187_v3, 1  ;;  %v194_v11 = vsel %vm193_vm0, %v192_v4, %v184_v0  ;;  %v247_v17 = vrot.slane %v240_v13, 7  ;;  %v239_v20 = vld [vmem:[%s1348_s17 + $0x1] sm:$0x1]  ;;  %v242_v21 = vld [vmem:[%s1348_s17 + $0x31] sm:$0x1] }
  0x12   : > { %v209_v12 = vsel %vm208_vm2, %v207_v7, %v206_v6  ;;  %v197_v14 = vsel %vm196_vm1, %v195_v5, %v194_v11  ;;  %v249_v22 = vrot.slane %v241_v16, 6  ;;  %v258_v24 = vrot.slane %v239_v20, 4  ;;  %v304_v34 = vld [vmem:[%s1348_s17 + $0x12] sm:$0x1]  ;;  %v305_v35 = vld [vmem:[%s1348_s17 + $0x22] sm:$0x1] }
  0x13   : > { %v212_v15 = vsel %vm211_vm3, %v210_v9, %v209_v12  ;;  %v1361_v18 = vsel %vm199_vm4, %v198_v8, %v197_v14  ;;  %v248_v23 = vsel %vm193_vm0, %v247_v17, %v239_v20  ;;  %v259_v25 = vrot.slane %v240_v13, 3  ;;  %v303_v37 = vld [vmem:[%s1348_s17 + $0x2] sm:$0x1]  ;;  %v306_v38 = vld [vmem:[%s1348_s17 + $0x32] sm:$0x1]  ;;  %s1302_s4 = smov 63  }
  0x14   : > { %221 = vrot.lane.b32.xlu1 %v1361_v18, %s1289_s18  ;;  %201 = vrot.lane.b32.xlu0 %v1361_v18, %s1290_s19  ;;  %v215_v19 = vsel %vm214_vm5, %v213_v10, %v212_v15  ;;  %v251_v26 = vrot.slane %v242_v21, 5  ;;  %v250_v27 = vsel %vm196_vm1, %v249_v22, %v248_v23  ;;  %v261_v28 = vrot.slane %v241_v16, 2  ;;  %v367_v51 = vld [vmem:[%s1348_s17 + $0x13] sm:$0x1]  ;;  %v368_v52 = vld [vmem:[%s1348_s17 + $0x23] sm:$0x1] }
  0x15   : > { %234 = vrot.lane.b32.xlu2 %v215_v19, %s1291_s20  ;;  %v260_v29 = vsel %vm208_vm2, %v259_v25, %v258_v24  ;;  %v263_v31 = vrot.slane %v242_v21, 1  ;;  %v311_v36 = vrot.slane %v304_v34, 7  ;;  %v313_v39 = vrot.slane %v305_v35, 6  ;;  %v366_v54 = vld [vmem:[%s1348_s17 + $0x3] sm:$0x1]  ;;  %s1303_s5 = smov 81  }
  0x16   : > { %v252_v30 = vsel %vm199_vm4, %v251_v26, %v250_v27  ;;  %v262_v32 = vsel %vm211_vm3, %v261_v28, %v260_v29  ;;  %v322_v40 = vrot.slane %v303_v37, 4  ;;  %v323_v41 = vrot.slane %v304_v34, 3  ;;  %v369_v55 = vld [vmem:[%s1348_s17 + $0x33] sm:$0x1]  ;;  %v430_v4 = vld [vmem:[%s1348_s17 + $0x14] sm:$0x1] }
  0x17   : > { %v1380_v33 = vsel %vm214_vm5, %v263_v31, %v262_v32  ;;  %v312_v42 = vsel %vm193_vm0, %v311_v36, %v303_v37  ;;  %v315_v43 = vrot.slane %v306_v38, 5  ;;  %v325_v44 = vrot.slane %v305_v35, 2  ;;  %v431_v5 = vld [vmem:[%s1348_s17 + $0x24] sm:$0x1]  ;;  %v432_v8 = vld [vmem:[%s1348_s17 + $0x34] sm:$0x1] }
  0x18   : > { %v314_v45 = vsel %vm196_vm1, %v313_v39, %v312_v42  ;;  %v324_v46 = vsel %vm208_vm2, %v323_v41, %v322_v40  ;;  %v327_v47 = vrot.slane %v306_v38, 1  ;;  %v374_v53 = vrot.slane %v367_v51, 7  ;;  %v429_v7 = vld [vmem:[%s1348_s17 + $0x4] sm:$0x1]  ;;  %s1304_s6 = smov 80   ;;  %s1306_s7 = smov 79  }
  0x19   : > { %v316_v48 = vsel %vm199_vm4, %v315_v43, %v314_v45  ;;  %v326_v49 = vsel %vm211_vm3, %v325_v44, %v324_v46  ;;  %v376_v56 = vrot.slane %v368_v52, 6  ;;  %v385_v57 = vrot.slane %v366_v54, 4  ;;  %v493_v23 = vld [vmem:[%s1348_s17 + $0x15] sm:$0x1]  ;;  %v494_v24 = vld [vmem:[%s1348_s17 + $0x25] sm:$0x1] }
  0x1a   : > { %v328_v50 = vsel %vm214_vm5, %v327_v47, %v326_v49  ;;  %v386_v58 = vrot.slane %v367_v51, 3  ;;  %v375_v59 = vsel %vm193_vm0, %v374_v53, %v366_v54  ;;  %v378_v60 = vrot.slane %v369_v55, 5  ;;  %v492_v27 = vld [vmem:[%s1348_s17 + $0x5] sm:$0x1]  ;;  %v495_v28 = vld [vmem:[%s1348_s17 + $0x35] sm:$0x1] }
  0x1b   : > { %v388_v61 = vrot.slane %v368_v52, 2  ;;  %v377_v62 = vsel %vm196_vm1, %v376_v56, %v375_v59  ;;  %v390_v0 = vrot.slane %v369_v55, 1  ;;  %v437_v6 = vrot.slane %v430_v4, 7  ;;  %s1307_s8 = smov 97   ;;  %s1308_s9 = smov 96  }
  0x1c   : > { %226 = vrot.lane.b32.xlu1 %v215_v19, %s1292_s21  ;;  %216 = vrot.lane.b32.xlu0 %v215_v19, %s1293_s22  ;;  %v387_v63 = vsel %vm208_vm2, %v386_v58, %v385_v57  ;;  %v379_v1 = vsel %vm199_vm4, %v378_v60, %v377_v62  ;;  %v439_v9 = vrot.slane %v431_v5, 6  ;;  %v448_v10 = vrot.slane %v429_v7, 4  ;;  %s1309_s10 = smov 95   ;;  %v556_v44 = vld [vmem:[%s1348_s17 + $0x16] sm:$0x1]  ;;  %s1310_s11 = smov 113  }
  0x1d   : > { %253 = vrot.lane.b32.xlu2 %v252_v30, %s1294_s23  ;;  %v389_v2 = vsel %vm211_vm3, %v388_v61, %v387_v63  ;;  %v449_v11 = vrot.slane %v430_v4, 3  ;;  %v438_v12 = vsel %vm193_vm0, %v437_v6, %v429_v7  ;;  %v441_v13 = vrot.slane %v432_v8, 5  ;;  %v555_v49 = vld [vmem:[%s1348_s17 + $0x6] sm:$0x1]  ;;  %v618_v63 = vld [vmem:[%s1348_s17 + $0x7] sm:$0x1] }
  0x1e   : > { %v391_v3 = vsel %vm214_vm5, %v390_v0, %v389_v2  ;;  %v451_v14 = vrot.slane %v431_v5, 2  ;;  %v440_v15 = vsel %vm196_vm1, %v439_v9, %v438_v12  ;;  %v453_v17 = vrot.slane %v432_v8, 1  ;;  %v619_v0 = vld [vmem:[%s1348_s17 + $0x17] sm:$0x1]  ;;  %s1311_s14 = smov 112   ;;  %s1312_s15 = smov 111  }
  0x1f   : > { %v450_v16 = vsel %vm208_vm2, %v449_v11, %v448_v10  ;;  %v442_v19 = vsel %vm199_vm4, %v441_v13, %v440_v15  ;;  %v1305_v22 = vmov 0.0   ;;  %v500_v25 = vrot.slane %v493_v23, 7  ;;  %v1500_v6 = vld [vmem:[%s1348_s17 + $0x37] sm:$0x1] }
  0x20   : > { %v452_v20 = vsel %vm211_vm3, %v451_v14, %v450_v16  ;;  %176 = vst [vmem:[#allocation2 + $0x20] sm:$0xff] %v1305_v22  ;;  %v502_v29 = vrot.slane %v494_v24, 6  ;;  %v512_v31 = vrot.slane %v493_v23, 3  ;;  %v504_v34 = vrot.slane %v495_v28, 5 }
  0x21   : > { %v454_v21 = vsel %vm214_vm5, %v453_v17, %v452_v20  ;;  %172 = vst [vmem:[#allocation2] sm:$0xff] %v1305_v22  ;;  %v501_v32 = vsel %vm193_vm0, %v500_v25, %v492_v27  ;;  %v514_v35 = vrot.slane %v494_v24, 2  ;;  %v516_v39 = vrot.slane %v495_v28, 1  ;;  %v1529_v20 = vld [vmem:[%s1348_s17 + $0x18] sm:$0x1] }
  0x22   : > { %173 = vst [vmem:[#allocation2 + $0x8] sm:$0xff] %v1305_v22  ;;  %v503_v36 = vsel %vm196_vm1, %v502_v29, %v501_v32  ;;  %v563_v47 = vrot.slane %v556_v44, 7  ;;  %v574_v52 = vrot.slane %v555_v49, 4  ;;  %v575_v53 = vrot.slane %v556_v44, 3 }
  0x23   : > { %174 = vst [vmem:[#allocation2 + $0x10] sm:$0xff] %v1305_v22  ;;  %v1457_v40 = vsel %vm199_vm4, %v504_v34, %v503_v36  ;;  %vm2048_vm12 = vcmask 130060   ;;  %vm2055_vm13 = vcmask 261252   ;;  %vm2047_vm14 = vcmask 261260  }
  0x24   : > { %270 = vrot.lane.b32.xlu1 %v252_v30, %s1295_s24  ;;  %265 = vrot.lane.b32.xlu0 %v1380_v33, %s1296_s25  ;;  %175 = vst [vmem:[#allocation2 + $0x18] sm:$0xff] %v1305_v22  ;;  %v564_v54 = vsel %vm193_vm0, %v563_v47, %v555_v49  ;;  %v576_v60 = vsel %vm208_vm2, %v575_v53, %v574_v52  ;;  %v636_v2 = vrot.slane %v618_v63, 4  ;;  %v641_v9 = vrot.slane %v1500_v6, 1 }
  0x25   : > { %275 = vrot.lane.b32.xlu2 %v1380_v33, %s1290_s19  ;;  %177 = vst [vmem:[#allocation2 + $0x28] sm:$0xff] %v1305_v22  ;;  %vm2052_vm15 = vcmask 380160   ;;  %v626_v17 = vrot.slane %v619_v0, 7  ;;  %v684_v23 = vrot.slane %v1529_v20, 7 }
  0x26   : > { %178 = vst [vmem:[#allocation2 + $0x30] sm:$0xff] %v1305_v22 }
  0x27   : > { %179 = vst [vmem:[#allocation2 + $0x38] sm:$0xff] %v1305_v22  ;;  %v627_v28 = vsel %vm193_vm0, %v626_v17, %v618_v63 }
  0x28   : > { %180 = vst [vmem:[#allocation2 + $0x40] sm:$0xff] %v1305_v22 }
  0x29   : > { %181 = vst [vmem:[#allocation2 + $0x48] sm:$0xff] %v1305_v22 }
  0x2a   : > { %182 = vst [vmem:[#allocation2 + $0x50] sm:$0xff] %v1305_v22  ;;  %v1536_v22 = vld [vmem:[%s1348_s17 + $0x38] sm:$0x1] }
  0x2b   : > { %233 = vst.msk [vmem:[#allocation2 + $0x20] sm:$0xf] %vm232_vm7, %v1361_v18  ;;  %v557_v18 = vld [vmem:[%s1348_s17 + $0x26] sm:$0x1]  ;;  %v688_v25 = vrot.slane %v1536_v22, 5 }
  0x2c   : > { %285 = vrot.lane.b32.xlu1 %v1380_v33, %s1289_s18  ;;  %280 = vrot.lane.b32.xlu0 %v252_v30, %s1293_s22  ;;  %v565_v51 = vrot.slane %v557_v18, 6  ;;  %v577_v56 = vrot.slane %v557_v18, 2  ;;  %v732_v18 = vld [vmem:[%s1348_s17 + $0x19] sm:$0x1] }
  0x2d   : > { %290 = vrot.lane.b32.xlu2 %v252_v30, %s1292_s21 }
  0x2e   : > { %v566_v59 = vsel %vm196_vm1, %v565_v51, %v564_v54  ;;  %v578_v5 = vsel %vm211_vm3, %v577_v56, %v576_v60  ;;  %v1582_v51 = vld [vmem:[%s1348_s17 + $0x39] sm:$0x1]  ;;  %v699_v60 = vrot.slane %v1536_v22, 1 }
  0x34   : > { %317 = vrot.lane.b32.xlu1 %v316_v48, %s1297_s26  ;;  %298 = vrot.lane.b32.xlu0 %v252_v30, %s1291_s20  ;;  %v511_v30 = vrot.slane %v492_v27, 4  ;;  %v676_v27 = vld [vmem:[%s1348_s17 + $0x8] sm:$0x1] }
  0x35   : > { %329 = vrot.lane.b32.xlu2 %v328_v50, %s1298_s27  ;;  %v685_v29 = vsel %vm193_vm0, %v684_v23, %v676_v27  ;;  %v694_v44 = vrot.slane %v676_v27, 4 }
  0x36   : > { %v513_v37 = vsel %vm208_vm2, %v512_v31, %v511_v30  ;;  %v630_v31 = vrot.slane %v1500_v6, 5  ;;  %v1617_v6 = vld [vmem:[%s1348_s17 + $0x2b] sm:$0x1] }
  0x37   : > { %v515_v41 = vsel %vm211_vm3, %v514_v35, %v513_v37 }
  0x38   : > { %v517_v42 = vsel %vm214_vm5, %v516_v39, %v515_v41 }
  0x3c   : > { %339 = vrot.lane.b32.xlu1 %v328_v50, %s1294_s23  ;;  %334 = vrot.lane.b32.xlu0 %v316_v48, %s1299_s28 }
  0x3d   : > { %344 = vrot.lane.b32.xlu2 %v316_v48, %s1296_s25 }
  0x44   : > { %354 = vrot.lane.b32.xlu1 %v316_v48, %s1290_s19  ;;  %349 = vrot.lane.b32.xlu0 %v328_v50, %s1295_s24 }
  0x45   : > { %358 = vrot.lane.b32.xlu2 %v328_v50, %s1293_s22  ;;  %v558_v50 = vld [vmem:[%s1348_s17 + $0x36] sm:$0x1] }
  0x46   : > { %v567_v55 = vrot.slane %v558_v50, 5  ;;  %v579_v61 = vrot.slane %v558_v50, 1  ;;  %v750_v50 = vrot.slane %v732_v18, 3 }
  0x48   : > { %v1495_v4 = vsel %vm199_vm4, %v567_v55, %v566_v59  ;;  %v580_v11 = vsel %vm214_vm5, %v579_v61, %v578_v5  ;;  %v754_v55 = vrot.slane %v1582_v51, 1  ;;  %v1614_v5 = vld [vmem:[%s1348_s17 + $0xa] sm:$0x1] }
  0x4c   : > { %380 = vrot.lane.b32.xlu1 %v379_v1, %s1300_s29  ;;  %362 = vrot.lane.b32.xlu0 %v316_v48, %s1289_s18 }
  0x4d   : > { %392 = vrot.lane.b32.xlu2 %v391_v3, %s1301_s30 }
  0x54   : > { %402 = vrot.lane.b32.xlu1 %v391_v3, %s1297_s26  ;;  %397 = vrot.lane.b32.xlu0 %v379_v1, %s1302_s4 }
  0x55   : > { %407 = vrot.lane.b32.xlu2 %v379_v1, %s1298_s27 }
  0x5c   : > { %417 = vrot.lane.b32.xlu1 %v379_v1, %s1294_s23  ;;  %412 = vrot.lane.b32.xlu0 %v391_v3, %s1299_s28 }
  0x5d   : > { %421 = vrot.lane.b32.xlu2 %v391_v3, %s1296_s25  ;;  %v637_v3 = vrot.slane %v619_v0, 3  ;;  %v1605_v0 = vld [vmem:[%s1348_s17 + $0x2a] sm:$0x1] }
  0x5f   : > { %v638_v8 = vsel %vm208_vm2, %v637_v3, %v636_v2  ;;  %v739_v2 = vrot.slane %v732_v18, 7  ;;  %v1701_v18 = vld [vmem:[%s1348_s17 + $0xd] sm:$0x1] }
  0x64   : > { %443 = vrot.lane.b32.xlu1 %v442_v19, %s1303_s5  ;;  %425 = vrot.lane.b32.xlu0 %v379_v1, %s1295_s24  ;;  %v1492_v1 = vld [vmem:[%s1348_s17 + $0x27] sm:$0x1] }
  0x65   : > { %455 = vrot.lane.b32.xlu2 %v454_v21, %s1304_s6  ;;  %v639_v7 = vrot.slane %v1492_v1, 2 }
  0x67   : > { %v640_v10 = vsel %vm211_vm3, %v639_v7, %v638_v8  ;;  %v1624_v8 = vld [vmem:[%s1348_s17 + $0xb] sm:$0x1] }
  0x68   : > { %v1513_v12 = vsel %vm214_vm5, %v641_v9, %v640_v10  ;;  %v1628_v10 = vld [vmem:[%s1348_s17 + $0x3a] sm:$0x1] }
  0x6c   : > { %465 = vrot.lane.b32.xlu1 %v454_v21, %s1300_s29  ;;  %460 = vrot.lane.b32.xlu0 %v442_v19, %s1306_s7 }
  0x6d   : > { %470 = vrot.lane.b32.xlu2 %v442_v19, %s1301_s30 }
  0x6f   : > { %v235_v26 = vpop.permute.xlu2 %234 }
  0x70   : > { %238 = vst.msk [vmem:[#allocation2 + $0x20] sm:$0xf0] %vm2049_vm6, %v235_v26  ;;  %vm2057_vm6 = vcmask 523652   ;;  %v628_v26 = vrot.slane %v1492_v1, 6 }
  0x72   : > { %v629_v36 = vsel %vm196_vm1, %v628_v26, %v627_v28  ;;  %v1656_v26 = vld [vmem:[%s1348_s17 + $0x2c] sm:$0x1] }
  0x74   : > { %480 = vrot.lane.b32.xlu1 %v442_v19, %s1297_s26  ;;  %475 = vrot.lane.b32.xlu0 %v454_v21, %s1302_s4 }
  0x75   : > { %484 = vrot.lane.b32.xlu2 %v454_v21, %s1298_s27  ;;  %v1533_v21 = vld [vmem:[%s1348_s17 + $0x28] sm:$0x1] }
  0x76   : > { %v686_v24 = vrot.slane %v1533_v21, 6  ;;  %v697_v53 = vrot.slane %v1533_v21, 2 }
  0x77   : > { %v254_v38 = vpop.permute.xlu2 %253 }
  0x78   : > { %v687_v30 = vsel %vm196_vm1, %v686_v24, %v685_v29 }
  0x79   : > { %v1554_v32 = vsel %vm199_vm4, %v688_v25, %v687_v30  ;;  %v1662_v30 = vld [vmem:[%s1348_s17 + $0xc] sm:$0x1] }
  0x7a   : > { %714 = vst.msk [vmem:[#allocation2 + $0x28] sm:$0xf] %vm232_vm7, %v1554_v32  ;;  %vm2061_vm7 = vcmask 519552  }
  0x7c   : > { %506 = vrot.lane.b32.xlu1 %v1457_v40, %s1307_s8  ;;  %488 = vrot.lane.b32.xlu0 %v442_v19, %s1299_s28 }
  0x7d   : > { %518 = vrot.lane.b32.xlu2 %v517_v42, %s1308_s9 }
  0x7f   : > { %v276_v43 = vpop.permute.xlu2 %275 }
  0x84   : > { %528 = vrot.lane.b32.xlu1 %v517_v42, %s1303_s5  ;;  %523 = vrot.lane.b32.xlu0 %v1457_v40, %s1309_s10 }
  0x85   : > { %533 = vrot.lane.b32.xlu2 %v1457_v40, %s1304_s6 }
  0x86   : > { %v222_v45 = vpop.permute.xlu1 %221  ;;  %v202_v46 = vpop.permute.xlu0 %201 }
  0x87   : > { %225 = vst.msk [vmem:[#allocation2 + $0x10] sm:$0xf] %vm2067_vm8, %v222_v45  ;;  %v291_v48 = vpop.permute.xlu2 %290  ;;  %v695_v45 = vrot.slane %v1529_v20, 3  ;;  %v743_v20 = vrot.slane %v1582_v51, 5 }
  0x88   : > { %205 = vst.msk [vmem:[#allocation2] sm:$0xf] %vm2065_vm9, %v202_v46  ;;  %v731_v46 = vld [vmem:[%s1348_s17 + $0x9] sm:$0x1] }
  0x89   : > { %257 = vst.msk [vmem:[#allocation2] sm:$0xf] %vm2051_vm10, %v254_v38  ;;  %vm2056_vm10 = vcmask 257152   ;;  %v631_v38 = vsel %vm199_vm4, %v630_v31, %v629_v36  ;;  %v749_v49 = vrot.slane %v731_v46, 4  ;;  %v696_v56 = vsel %vm208_vm2, %v695_v45, %v694_v44  ;;  %v1690_v44 = vld [vmem:[%s1348_s17 + $0x1d] sm:$0x1] }
  0x8a   : > { %294 = vst.msk [vmem:[#allocation2 + $0x30] sm:$0xf] %vm2050_vm11, %v291_v48  ;;  %vm2054_vm11 = vcmask 253060   ;;  %v733_v48 = vld [vmem:[%s1348_s17 + $0x29] sm:$0x1]  ;;  %v698_v63 = vsel %vm211_vm3, %v697_v53, %v696_v56  ;;  %v910_v36 = vrot.slane %v1656_v26, 6 }
  0x8b   : > { %v752_v52 = vrot.slane %v733_v48, 2  ;;  %v751_v54 = vsel %vm208_vm2, %v750_v50, %v749_v49  ;;  %v1620_v7 = vsel %vm214_vm5, %v699_v60, %v698_v63  ;;  %v1694_v45 = vld [vmem:[%s1348_s17 + $0x2d] sm:$0x1]  ;;  %v807_v60 = vrot.slane %v1605_v0, 2 }
  0x8c   : > { %543 = vrot.lane.b32.xlu1 %v1457_v40, %s1300_s29  ;;  %538 = vrot.lane.b32.xlu0 %v517_v42, %s1306_s7  ;;  %v967_v49 = vrot.slane %v1694_v45, 6  ;;  %v809_v63 = vrot.slane %v1628_v10, 1 }
  0x8d   : > { %547 = vrot.lane.b32.xlu2 %v517_v42, %s1301_s30 }
  0x8e   : > { %v227_v57 = vpop.permute.xlu1 %226  ;;  %v217_v58 = vpop.permute.xlu0 %216 }
  0x8f   : > { %230 = vst.msk [vmem:[#allocation2 + $0x10] sm:$0xf0] %vm2048_vm12, %v227_v57  ;;  %v330_v62 = vpop.permute.xlu2 %329  ;;  %vm2060_vm12 = vcmask 392452   ;;  %v753_v57 = vsel %vm211_vm3, %v752_v52, %v751_v54  ;;  %v804_v54 = vrot.slane %v1614_v5, 4 }
  0x90   : > { %220 = vst.msk [vmem:[#allocation2] sm:$0xf0] %vm2055_vm13, %v217_v58  ;;  %v1594_v58 = vld [vmem:[%s1348_s17 + $0x1a] sm:$0x1]  ;;  %v1597_v59 = vsel %vm214_vm5, %v754_v55, %v753_v57 }
  0x91   : > { %279 = vst.msk [vmem:[#allocation2 + $0x10] sm:$0xf0] %vm2047_vm14, %v276_v43  ;;  %vm296_vm14 = vcmask 130052   ;;  %v794_v1 = vrot.slane %v1594_v58, 7  ;;  %v805_v55 = vrot.slane %v1594_v58, 3 }
  0x92   : > { %297 = vst.msk [vmem:[#allocation2 + $0x30] sm:$0xf0] %vm296_vm14, %v1380_v33  ;;  %v1733_v58 = vld [vmem:[%s1348_s17 + $0x1e] sm:$0x1] }
  0x93   : > { %644 = vst.msk [vmem:[#allocation2 + $0x8] sm:$0xf0] %vm296_vm14, %v1513_v12 }
  0x94   : > { %569 = vrot.lane.b32.xlu1 %v1495_v4, %s1310_s11  ;;  %551 = vrot.lane.b32.xlu0 %v1457_v40, %s1302_s4  ;;  %781 = vst.msk [vmem:[#allocation2 + $0x38] sm:$0xf0] %vm296_vm14, %v1597_v59  ;;  %vm2063_vm14 = vcmask 523660  }
  0x95   : > { %581 = vrot.lane.b32.xlu2 %v580_v11, %s1311_s14 }
  0x96   : > { %v271_v13 = vpop.permute.xlu1 %270  ;;  %v266_v14 = vpop.permute.xlu0 %265 }
  0x97   : > { %274 = vst.msk [vmem:[#allocation2 + $0x10] sm:$0xf] %vm2052_vm15, %v271_v13  ;;  %v345_v15 = vpop.permute.xlu2 %344  ;;  %vm2053_vm15 = vcmask 388352   ;;  %v795_v13 = vsel %vm193_vm0, %v794_v1, %v1614_v5  ;;  %v1022_v5 = vrot.slane %v1733_v58, 7 }
  0x98   : > { %269 = vst.msk [vmem:[#allocation2] sm:$0xf0] %vm2060_vm12, %v266_v14  ;;  %v740_v14 = vsel %vm193_vm0, %v739_v2, %v731_v46 }
  0x99   : > { %333 = vst.msk [vmem:[#allocation2] sm:$0xf0] %vm2057_vm6, %v330_v62  ;;  %vm337_vm6 = vcmask 511360  }
  0x9c   : > { %591 = vrot.lane.b32.xlu1 %v580_v11, %s1307_s8  ;;  %586 = vrot.lane.b32.xlu0 %v1495_v4, %s1312_s15 }
  0x9d   : > { %596 = vrot.lane.b32.xlu2 %v1495_v4, %s1308_s9 }
  0x9e   : > { %v286_v33 = vpop.permute.xlu1 %285  ;;  %v281_v16 = vpop.permute.xlu0 %280 }
  0x9f   : > { %289 = vst.msk [vmem:[#allocation2 + $0x20] sm:$0xf0] %vm2054_vm11, %v286_v33  ;;  %v359_v19 = vpop.permute.xlu2 %358  ;;  %vm2058_vm11 = vcmask 117760   ;;  %v853_v33 = vrot.slane %v1617_v6, 6 }
  0xa0   : > { %284 = vst.msk [vmem:[#allocation2 + $0x20] sm:$0xf] %vm2056_vm10, %v281_v16  ;;  %vm2059_vm10 = vcmask 392460   ;;  %v1643_v16 = vld [vmem:[%s1348_s17 + $0x1c] sm:$0x1] }
  0xa1   : > { %348 = vst.msk [vmem:[#allocation2 + $0x20] sm:$0xf] %vm2053_vm15, %v345_v15  ;;  %vm2073_vm15 = vcmask 519560   ;;  %v1635_v15 = vld [vmem:[%s1348_s17 + $0x3b] sm:$0x1]  ;;  %v908_v27 = vrot.slane %v1643_v16, 7 }
  0xa2   : > { %361 = vst.msk [vmem:[#allocation2 + $0x30] sm:$0xf0] %vm2055_vm13, %v359_v19  ;;  %vm2071_vm13 = vcmask 654852   ;;  %v798_v19 = vrot.slane %v1628_v10, 5  ;;  %v855_v25 = vrot.slane %v1635_v15, 5 }
  0xa4   : > { %606 = vrot.lane.b32.xlu1 %v1495_v4, %s1303_s5  ;;  %601 = vrot.lane.b32.xlu0 %v580_v11, %s1309_s10 }
  0xa5   : > { %610 = vrot.lane.b32.xlu2 %v580_v11, %s1304_s6  ;;  %v796_v11 = vrot.slane %v1605_v0, 6 }
  0xa6   : > { %v318_v34 = vpop.permute.xlu1 %317  ;;  %v299_v35 = vpop.permute.xlu0 %298 }
  0xa7   : > { %321 = vst.msk [vmem:[#allocation2] sm:$0xf] %vm2073_vm15, %v318_v34  ;;  %v393_v37 = vpop.permute.xlu2 %392  ;;  %v797_v23 = vsel %vm196_vm1, %v796_v11, %v795_v13  ;;  %v1746_v11 = vld [vmem:[%s1348_s17 + $0xe] sm:$0x1] }
  0xa8   : > { %302 = vst.msk [vmem:[#allocation2 + $0x40] sm:$0xf] %vm2058_vm11, %v299_v35  ;;  %vm2062_vm11 = vcmask 384260   ;;  %v1665_v31 = vsel %vm199_vm4, %v798_v19, %v797_v23  ;;  %v1672_v35 = vld [vmem:[%s1348_s17 + $0x3c] sm:$0x1] }
  0xa9   : > { %396 = vst.msk [vmem:[#allocation2] sm:$0xf0] %vm2071_vm13, %v393_v37 }
  0xac   : > { %632 = vrot.lane.b32.xlu1 %v631_v38, %s1292_s21  ;;  %614 = vrot.lane.b32.xlu0 %v1495_v4, %s1306_s7  ;;  %v1610_v4 = vld [vmem:[%s1348_s17 + $0x1b] sm:$0x1] }
  0xad   : > { %645 = vrot.lane.b32.xlu2 %v631_v38, %s1291_s20  ;;  %v851_v9 = vrot.slane %v1610_v4, 7 }
  0xae   : > { %v340_v39 = vpop.permute.xlu1 %339  ;;  %v335_v40 = vpop.permute.xlu0 %334 }
  0xaf   : > { %343 = vst.msk [vmem:[#allocation2 + $0x10] sm:$0xf0] %vm2059_vm10, %v340_v39  ;;  %v408_v41 = vpop.permute.xlu2 %407  ;;  %vm383_vm10 = vcmask 650760   ;;  %v852_v17 = vsel %vm193_vm0, %v851_v9, %v1624_v8  ;;  %v912_v39 = vrot.slane %v1672_v35, 5 }
  0xb0   : > { %338 = vst.msk [vmem:[#allocation2 + $0x10] sm:$0xf] %vm337_vm6, %v335_v40  ;;  %v854_v29 = vsel %vm196_vm1, %v853_v33, %v852_v17 }
  0xb1   : > { %411 = vst.msk [vmem:[#allocation2 + $0x20] sm:$0xf] %vm2061_vm7, %v408_v41  ;;  %vm400_vm7 = vcmask 642560   ;;  %v1676_v37 = vsel %vm199_vm4, %v855_v25, %v854_v29  ;;  %v864_v25 = vrot.slane %v1617_v6, 2 }
  0xb4   : > { %654 = vrot.lane.b32.xlu1 %v631_v38, %s1311_s14  ;;  %649 = vrot.lane.b32.xlu0 %v1513_v12, %s1310_s11 }
  0xb5   : > { %659 = vrot.lane.b32.xlu2 %v1513_v12, %s1312_s15 }
  0xb6   : > { %v355_v42 = vpop.permute.xlu1 %354  ;;  %v350_v43 = vpop.permute.xlu0 %349 }
  0xb7   : > { %357 = vst.msk [vmem:[#allocation2 + $0x30] sm:$0xf] %vm2065_vm9, %v355_v42  ;;  %v422_v47 = vpop.permute.xlu2 %421  ;;  %vm2085_vm9 = vcmask 523652  }
  0xb8   : > { %353 = vst.msk [vmem:[#allocation2 + $0x20] sm:$0xf0] %vm2062_vm11, %v350_v43  ;;  %vm2064_vm11 = vcmask 650752  }
  0xb9   : > { %424 = vst.msk [vmem:[#allocation2 + $0x30] sm:$0xf0] %vm2060_vm12, %v422_v47  ;;  %vm2076_vm12 = vcmask 786052   ;;  %v965_v47 = vrot.slane %v1690_v44, 7 }
  0xbb   : > { %v966_v50 = vsel %vm193_vm0, %v965_v47, %v1701_v18 }
  0xbc   : > { %668 = vrot.lane.b32.xlu1 %v1513_v12, %s1308_s9  ;;  %664 = vrot.lane.b32.xlu0 %v631_v38, %s1307_s8  ;;  %v741_v12 = vrot.slane %v733_v48, 6  ;;  %v1705_v48 = vld [vmem:[%s1348_s17 + $0x3d] sm:$0x1]  ;;  %v968_v57 = vsel %vm196_vm1, %v967_v49, %v966_v50 }
  0xbd   : > { %672 = vrot.lane.b32.xlu2 %v631_v38, %s1309_s10  ;;  %v909_v38 = vsel %vm193_vm0, %v908_v27, %v1662_v30  ;;  %v969_v53 = vrot.slane %v1705_v48, 5 }
  0xbe   : > { %v381_v61 = vpop.permute.xlu1 %380  ;;  %v363_v62 = vpop.permute.xlu0 %362  ;;  %v742_v24 = vsel %vm196_vm1, %v741_v12, %v740_v14  ;;  %v911_v42 = vsel %vm196_vm1, %v910_v36, %v909_v38  ;;  %v1753_v12 = vld [vmem:[%s1348_s17 + $0x3e] sm:$0x1]  ;;  %v1023_v14 = vsel %vm193_vm0, %v1022_v5, %v1746_v11  ;;  %v1789_v36 = vld [vmem:[%s1348_s17 + $0x2f] sm:$0x1] }
  0xbf   : > { %384 = vst.msk [vmem:[#allocation2] sm:$0xf] %vm383_vm10, %v381_v61  ;;  %v456_v3 = vpop.permute.xlu2 %455  ;;  %v1668_v34 = vsel %vm199_vm4, %v743_v20, %v742_v24  ;;  %v1697_v46 = vsel %vm199_vm4, %v912_v39, %v911_v42  ;;  %v1725_v61 = vsel %vm199_vm4, %v969_v53, %v968_v57  ;;  %v1026_v33 = vrot.slane %v1753_v12, 5 }
  0xc0   : > { %365 = vst.msk [vmem:[#allocation2 + $0x40] sm:$0xf] %vm2067_vm8, %v363_v62  ;;  %v806_v62 = vsel %vm208_vm2, %v805_v55, %v804_v54  ;;  %vm2069_vm8 = vcmask 654860   ;;  %v1092_v42 = vrot.slane %v1789_v36, 6  ;;  %v919_v53 = vrot.slane %v1643_v16, 3 }
  0xc1   : > { %459 = vst.msk [vmem:[#allocation2] sm:$0xf0] %vm2076_vm12, %v456_v3  ;;  %v808_v2 = vsel %vm211_vm3, %v807_v60, %v806_v62  ;;  %v1741_v3 = vld [vmem:[%s1348_s17 + $0x2e] sm:$0x1]  ;;  %v923_v16 = vrot.slane %v1672_v35, 1 }
  0xc2   : > { %v1749_v10 = vsel %vm214_vm5, %v809_v63, %v808_v2  ;;  %v1024_v13 = vrot.slane %v1741_v3, 6  ;;  %v976_v2 = vrot.slane %v1690_v44, 3 }
  0xc4   : > { %701 = vrot.lane.b32.xlu1 %v1620_v7, %s1293_s22  ;;  %690 = vrot.lane.b32.xlu0 %v1554_v32, %s1290_s19  ;;  %v1025_v20 = vsel %vm196_vm1, %v1024_v13, %v1023_v14 }
  0xc5   : > { %705 = vrot.lane.b32.xlu2 %v1554_v32, %s1289_s18  ;;  %v1771_v24 = vsel %vm199_vm4, %v1026_v33, %v1025_v20 }
  0xc6   : > { %v403_v21 = vpop.permute.xlu1 %402  ;;  %v398_v22 = vpop.permute.xlu0 %397 }
  0xc7   : > { %406 = vst.msk [vmem:[#allocation2 + $0x10] sm:$0xf0] %vm2063_vm14, %v403_v21  ;;  %v471_v28 = vpop.permute.xlu2 %470  ;;  %vm2066_vm14 = vcmask 515460   ;;  %v861_v21 = vrot.slane %v1624_v8, 4  ;;  %v866_v8 = vrot.slane %v1635_v15, 1 }
  0xc8   : > { %401 = vst.msk [vmem:[#allocation2 + $0x10] sm:$0xf] %vm400_vm7, %v398_v22  ;;  %v862_v22 = vrot.slane %v1610_v4, 3  ;;  %v1781_v4 = vld [vmem:[%s1348_s17 + $0x1f] sm:$0x1] }
  0xc9   : > { %474 = vst.msk [vmem:[#allocation2 + $0x20] sm:$0xf] %vm2064_vm11, %v471_v28  ;;  %vm2084_vm11 = vcmask 388360   ;;  %v1090_v38 = vrot.slane %v1781_v4, 7 }
  0xca   : > { %v863_v27 = vsel %vm208_vm2, %v862_v22, %v861_v21  ;;  %v1032_v21 = vrot.slane %v1746_v11, 4  ;;  %v1033_v22 = vrot.slane %v1733_v58, 3  ;;  %v1037_v58 = vrot.slane %v1753_v12, 1 }
  0xcb   : > { %v865_v29 = vsel %vm211_vm3, %v864_v25, %v863_v27 }
  0xcc   : > { %839 = vrot.lane.b32.xlu1 %v1665_v31, %s1289_s18  ;;  %782 = vrot.lane.b32.xlu0 %v1668_v34, %s1291_s20  ;;  %v1797_v15 = vsel %vm214_vm5, %v866_v8, %v865_v29  ;;  %v1034_v8 = vsel %vm208_vm2, %v1033_v22, %v1032_v21 }
  0xcd   : > { %896 = vrot.lane.b32.xlu2 %v1676_v37, %s1295_s24 }
  0xce   : > { %v418_v40 = vpop.permute.xlu1 %417  ;;  %v413_v41 = vpop.permute.xlu0 %412 }
  0xcf   : > { %420 = vst.msk [vmem:[#allocation2 + $0x30] sm:$0xf] %vm2084_vm11, %v418_v40  ;;  %v485_v43 = vpop.permute.xlu2 %484  ;;  %vm2080_vm11 = vcmask 781960   ;;  %v1794_v40 = vld [vmem:[%s1348_s17 + $0xf] sm:$0x1] }
  0xd0   : > { %416 = vst.msk [vmem:[#allocation2 + $0x20] sm:$0xf0] %vm2066_vm14, %v413_v41  ;;  %vm2086_vm14 = vcmask 380160   ;;  %v1801_v41 = vld [vmem:[%s1348_s17 + $0x3f] sm:$0x1] }
  0xd1   : > { %487 = vst.msk [vmem:[#allocation2 + $0x30] sm:$0xf0] %vm2085_vm9, %v485_v43  ;;  %vm2068_vm9 = vcmask 917252   ;;  %v1091_v43 = vsel %vm193_vm0, %v1090_v38, %v1794_v40  ;;  %v1094_v47 = vrot.slane %v1801_v41, 5  ;;  %vm541_vm0 = vcmask 777860  }
  0xd4   : > { %953 = vrot.lane.b32.xlu1 %v1697_v46, %s1299_s28  ;;  %715 = vrot.lane.b32.xlu0 %v1620_v7, %s1291_s20  ;;  %s1244_s20 = sshll.u32 %s2141_s13, 4 }
  0xd5   : > { %768 = vrot.lane.b32.xlu2 %v1668_v34, %s1293_s22 }
  0xd6   : > { %v444_v51 = vpop.permute.xlu1 %443  ;;  %v426_v52 = vpop.permute.xlu0 %425 }
  0xd7   : > { %447 = vst.msk [vmem:[#allocation2] sm:$0xf] %vm2080_vm11, %v444_v51  ;;  %v519_v56 = vpop.permute.xlu2 %518  ;;  %v1093_v51 = vsel %vm196_vm1, %v1092_v42, %v1091_v43  ;;  %vm572_vm1 = vcmask 1044360   ;;  %v1079_v42 = vrot.slane %v1794_v40, 4  ;;  %v1080_v43 = vrot.slane %v1781_v4, 3 }
  0xd8   : > { %428 = vst.msk [vmem:[#allocation2 + $0x40] sm:$0xf] %vm2086_vm14, %v426_v52  ;;  %vm463_vm14 = vcmask 773760   ;;  %v918_v52 = vrot.slane %v1662_v30, 4  ;;  %v1819_v55 = vsel %vm199_vm4, %v1094_v47, %v1093_v51  ;;  %vm2087_vm4 = vcmask 117760  }
  0xd9   : > { %522 = vst.msk [vmem:[#allocation2] sm:$0xf0] %vm2068_vm9, %v519_v56  ;;  %vm2070_vm9 = vcmask 781952   ;;  %v921_v56 = vrot.slane %v1656_v26, 2 }
  0xda   : > { %v920_v57 = vsel %vm208_vm2, %v919_v53, %v918_v52 }
  0xdb   : > { %v922_v62 = vsel %vm211_vm3, %v921_v56, %v920_v57 }
  0xdc   : > { %776 = vrot.lane.b32.xlu1 %v1668_v34, %s1292_s21  ;;  %772 = vrot.lane.b32.xlu0 %v1597_v59, %s1289_s18  ;;  %v1835_v63 = vsel %vm214_vm5, %v923_v16, %v922_v62 }
  0xdd   : > { %1010 = vrot.lane.b32.xlu2 %v1725_v61, %s1302_s4 }
  0xde   : > { %v466_v0 = vpop.permute.xlu1 %465  ;;  %v461_v1 = vpop.permute.xlu0 %460 }
  0xdf   : > { %469 = vst.msk [vmem:[#allocation2 + $0x10] sm:$0xf0] %vm2069_vm8, %v466_v0  ;;  %v534_v9 = vpop.permute.xlu2 %533  ;;  %vm2072_vm8 = vcmask 646660  }
  0xe0   : > { %464 = vst.msk [vmem:[#allocation2 + $0x10] sm:$0xf] %vm463_vm14, %v461_v1  ;;  %v975_v1 = vrot.slane %v1701_v18, 4  ;;  %v980_v18 = vrot.slane %v1705_v48, 1 }
  0xe1   : > { %537 = vst.msk [vmem:[#allocation2 + $0x20] sm:$0xf] %vm2070_vm9, %v534_v9  ;;  %vm509_vm9 = vcmask 913160   ;;  %v978_v9 = vrot.slane %v1694_v45, 2 }
  0xe2   : > { %v977_v13 = vsel %vm208_vm2, %v976_v2, %v975_v1 }
  0xe3   : > { %v979_v33 = vsel %vm211_vm3, %v978_v9, %v977_v13  ;;  %v1280_v9 = vld [vmem:[#allocation2 + $0x50] sm:$0xff] }
  0xe4   : > { %827 = vrot.lane.b32.xlu1 %v1749_v10, %s1295_s24  ;;  %823 = vrot.lane.b32.xlu0 %v1665_v31, %s1296_s25 }
  0xe5   : > { %831 = vrot.lane.b32.xlu2 %v1665_v31, %s1290_s19 }
  0xe6   : > { %v481_v17 = vpop.permute.xlu1 %480  ;;  %v476_v19 = vpop.permute.xlu0 %475 }
  0xe7   : > { %483 = vst.msk [vmem:[#allocation2 + $0x30] sm:$0xf] %vm2073_vm15, %v481_v17  ;;  %v548_v23 = vpop.permute.xlu2 %547  ;;  %vm526_vm15 = vcmask 904960   ;;  %v1862_v17 = vsel %vm214_vm5, %v980_v18, %v979_v33 }
  0xe8   : > { %479 = vst.msk [vmem:[#allocation2 + $0x20] sm:$0xf0] %vm2072_vm8, %v476_v19  ;;  %vm2075_vm8 = vcmask 786060  }
  0xe9   : > { %550 = vst.msk [vmem:[#allocation2 + $0x30] sm:$0xf0] %vm2071_vm13, %v548_v23  ;;  %vm2074_vm13 = vcmask 1048452   ;;  %v1035_v23 = vrot.slane %v1741_v3, 2 }
  0xec   : > { %1067 = vrot.lane.b32.xlu1 %v1771_v24, %s1306_s7  ;;  %835 = vrot.lane.b32.xlu0 %v1749_v10, %s1293_s22 }
  0xed   : > { %727 = vrot.lane.b32.xlu2 %v1554_v32, %s1312_s15 }
  0xee   : > { %v507_v28 = vpop.permute.xlu1 %506  ;;  %v489_v6 = vpop.permute.xlu0 %488 }
  0xef   : > { %510 = vst.msk [vmem:[#allocation2] sm:$0xf] %vm509_vm9, %v507_v28  ;;  %v582_v39 = vpop.permute.xlu2 %581 }
  0xf0   : > { %491 = vst.msk [vmem:[#allocation2 + $0x40] sm:$0xf] %vm337_vm6, %v489_v6 }
  0xf1   : > { %585 = vst.msk [vmem:[#allocation2] sm:$0xf0] %vm2074_vm13, %v582_v39  ;;  %vm2077_vm13 = vcmask 913152  }
  0xf4   : > { %884 = vrot.lane.b32.xlu1 %v1797_v15, %s1299_s28  ;;  %880 = vrot.lane.b32.xlu0 %v1676_v37, %s1298_s27 }
  0xf5   : > { %888 = vrot.lane.b32.xlu2 %v1676_v37, %s1294_s23 }
  0xf6   : > { %v529_v49 = vpop.permute.xlu1 %528  ;;  %v524_v50 = vpop.permute.xlu0 %523 }
  0xf7   : > { %532 = vst.msk [vmem:[#allocation2 + $0x10] sm:$0xf0] %vm2075_vm8, %v529_v49  ;;  %v597_v54 = vpop.permute.xlu2 %596  ;;  %vm2078_vm8 = vcmask 917260   ;;  %v1082_v49 = vrot.slane %v1789_v36, 2 }
  0xf8   : > { %527 = vst.msk [vmem:[#allocation2 + $0x10] sm:$0xf] %vm526_vm15, %v524_v50  ;;  %v1081_v50 = vsel %vm208_vm2, %v1080_v43, %v1079_v42  ;;  %vm2096_vm2 = vcmask 380160  }
  0xf9   : > { %600 = vst.msk [vmem:[#allocation2 + $0x20] sm:$0xf] %vm2077_vm13, %v597_v54  ;;  %vm2079_vm13 = vcmask 1040260   ;;  %v1083_v40 = vsel %vm211_vm3, %v1082_v49, %v1081_v50 }
  0xfc   : > { %1112 = vrot.lane.b32.xlu1 %v1819_v55, %s1309_s10  ;;  %892 = vrot.lane.b32.xlu0 %v1797_v15, %s1296_s25 }
  0xfd   : > { %709 = vrot.lane.b32.xlu2 %v1620_v7, %s1292_s21 }
  0xfe   : > { %v544_v30 = vpop.permute.xlu1 %543  ;;  %v539_v60 = vpop.permute.xlu0 %538 }
  0xff   : > { %546 = vst.msk [vmem:[#allocation2 + $0x30] sm:$0xf] %vm383_vm10, %v544_v30  ;;  %v611_v26 = vpop.permute.xlu2 %610 }
 0x100   : > { %542 = vst.msk [vmem:[#allocation2 + $0x20] sm:$0xf0] %vm541_vm0, %v539_v60 }
 0x101   : > { %613 = vst.msk [vmem:[#allocation2 + $0x30] sm:$0xf0] %vm2076_vm12, %v611_v26  ;;  %vm2083_vm12 = vcmask 1036160  }
 0x104   : > { %941 = vrot.lane.b32.xlu1 %v1835_v63, %s1302_s4  ;;  %937 = vrot.lane.b32.xlu0 %v1697_v46, %s1301_s30 }
 0x105   : > { %945 = vrot.lane.b32.xlu2 %v1697_v46, %s1297_s26 }
 0x106   : > { %v570_v35 = vpop.permute.xlu1 %569  ;;  %v552_v0 = vpop.permute.xlu0 %551 }
 0x107   : > { %573 = vst.msk [vmem:[#allocation2] sm:$0xf] %vm572_vm1, %v570_v35  ;;  %v646_v5 = vpop.permute.xlu2 %645 }
 0x108   : > { %554 = vst.msk [vmem:[#allocation2 + $0x40] sm:$0xf] %vm400_vm7, %v552_v0 }
 0x109   : > { %648 = vst.msk [vmem:[#allocation2 + $0x18] sm:$0xf] %vm2087_vm4, %v646_v5  ;;  %vm604_vm4 = vcmask 909060  }
 0x10c   : > { %764 = vrot.lane.b32.xlu1 %v1597_v59, %s1290_s19  ;;  %949 = vrot.lane.b32.xlu0 %v1835_v63, %s1298_s27 }
 0x10d   : > { %994 = vrot.lane.b32.xlu2 %v1725_v61, %s1304_s6 }
 0x10e   : > { %v592_v44 = vpop.permute.xlu1 %591  ;;  %v587_v14 = vpop.permute.xlu0 %586 }
 0x10f   : > { %595 = vst.msk [vmem:[#allocation2 + $0x10] sm:$0xf0] %vm2078_vm8, %v592_v44  ;;  %v660_v45 = vpop.permute.xlu2 %659  ;;  %vm2088_vm8 = vcmask 125960  }
 0x110   : > { %590 = vst.msk [vmem:[#allocation2 + $0x10] sm:$0xf] %vm2083_vm12, %v587_v14 }
 0x114   : > { %1002 = vrot.lane.b32.xlu1 %v1725_v61, %s1300_s29  ;;  %998 = vrot.lane.b32.xlu0 %v1862_v17, %s1306_s7 }
 0x115   : > { %1006 = vrot.lane.b32.xlu2 %v1862_v17, %s1301_s30 }
 0x116   : > { %v607_v48 = vpop.permute.xlu1 %606  ;;  %v602_v19 = vpop.permute.xlu0 %601 }
 0x117   : > { %609 = vst.msk [vmem:[#allocation2 + $0x30] sm:$0xf] %vm2080_vm11, %v607_v48  ;;  %v673_v20 = vpop.permute.xlu2 %672  ;;  %vm2081_vm11 = vcmask 1044352  }
 0x118   : > { %605 = vst.msk [vmem:[#allocation2 + $0x20] sm:$0xf0] %vm604_vm4, %v602_v19 }
 0x119   : > { %663 = vst.msk [vmem:[#allocation2 + $0x20] sm:$0xf0] %vm2079_vm13, %v660_v45  ;;  %vm2089_vm13 = vcmask 248960  }
 0x11c   : > { %756 = vrot.lane.b32.xlu1 %v1597_v59, %s1296_s25  ;;  %745 = vrot.lane.b32.xlu0 %v1668_v34, %s1294_s23  ;;  %v1036_v59 = vsel %vm211_vm3, %v1035_v23, %v1034_v8  ;;  %vm2097_vm3 = vcmask 121860  }
 0x11d   : > { %760 = vrot.lane.b32.xlu2 %v1668_v34, %s1295_s24  ;;  %v1894_v34 = vsel %vm214_vm5, %v1037_v58, %v1036_v59 }
 0x11e   : > { %v633_v25 = vpop.permute.xlu1 %632  ;;  %v615_v27 = vpop.permute.xlu0 %614 }
 0x11f   : > { %635 = vst.msk [vmem:[#allocation2 + $0x8] sm:$0xf] %vm2088_vm8, %v633_v25  ;;  %v706_v11 = vpop.permute.xlu2 %705  ;;  %vm2082_vm8 = vcmask 1048460  }
 0x120   : > { %617 = vst.msk [vmem:[#allocation2 + $0x40] sm:$0xf] %vm463_vm14, %v615_v27 }
 0x121   : > { %675 = vst.msk [vmem:[#allocation2 + $0x40] sm:$0xf] %vm526_vm15, %v673_v20 }
 0x122   : > { %708 = vst.msk [vmem:[#allocation2 + $0x18] sm:$0xf] %vm2089_vm13, %v706_v11  ;;  %vm2090_vm13 = vcmask 917252  }
 0x124   : > { %1051 = vrot.lane.b32.xlu1 %v1771_v24, %s1308_s9  ;;  %819 = vrot.lane.b32.xlu0 %v1749_v10, %s1294_s23  ;;  %s170_s23 = scalar_lea.vmem %s2046_s3, %s1244_s20 }
 0x125   : > { %1055 = vrot.lane.b32.xlu2 %v1894_v34, %s1309_s10 }
 0x126   : > { %v655_v3 = vpop.permute.xlu1 %654  ;;  %v650_v12 = vpop.permute.xlu0 %649 }
 0x127   : > { %658 = vst.msk [vmem:[#allocation2 + $0x20] sm:$0xf] %vm2081_vm11, %v655_v3  ;;  %v897_v28 = vpop.permute.xlu2 %896  ;;  %vm2091_vm11 = vcmask 257152  }
 0x128   : > { %653 = vst.msk [vmem:[#allocation2 + $0x10] sm:$0xf0] %vm2082_vm8, %v650_v12  ;;  %vm2092_vm8 = vcmask 261252  }
 0x12c   : > { %1063 = vrot.lane.b32.xlu1 %v1894_v34, %s1304_s6  ;;  %1059 = vrot.lane.b32.xlu0 %v1771_v24, %s1303_s5 }
 0x12d   : > { %719 = vrot.lane.b32.xlu2 %v1554_v32, %s1310_s11 }
 0x12e   : > { %v669_v6 = vpop.permute.xlu1 %668  ;;  %v665_v29 = vpop.permute.xlu0 %664  ;;  %v1120_v12 = vld [vmem:[#allocation2 + $0x20] sm:$0xff] }
 0x12f   : > { %671 = vst.msk [vmem:[#allocation2 + $0x30] sm:$0xf0] %vm2090_vm13, %v669_v6  ;;  %v769_v38 = vpop.permute.xlu2 %768  ;;  %vm2093_vm13 = vcmask 257160  }
 0x130   : > { %667 = vst.msk [vmem:[#allocation2 + $0x30] sm:$0xf] %vm509_vm9, %v665_v29  ;;  %v1118_v29 = vld [vmem:[#allocation2 + $0x10] sm:$0xff] }
 0x131   : > { %771 = vst.msk [vmem:[#allocation2 + $0x28] sm:$0xf] %vm2091_vm11, %v769_v38  ;;  %vm2094_vm11 = vcmask 117760   ;;  %v1116_v38 = vld [vmem:[#allocation2] sm:$0xff] }
 0x134   : > { %800 = vrot.lane.b32.xlu1 %v1665_v31, %s1297_s26  ;;  %723 = vrot.lane.b32.xlu0 %v1620_v7, %s1311_s14  ;;  %v1084_v7 = vrot.slane %v1801_v41, 1 }
 0x135   : > { %811 = vrot.lane.b32.xlu2 %v1749_v10, %s1298_s27 }
 0x136   : > { %v702_v39 = vpop.permute.xlu1 %701  ;;  %v691_v32 = vpop.permute.xlu0 %690  ;;  %v1085_v51 = vsel %vm214_vm5, %v1084_v7, %v1083_v40  ;;  %vm2098_vm5 = vcmask 125960  }
 0x137   : > { %704 = vst.msk [vmem:[#allocation2 + $0x8] sm:$0xf0] %vm2092_vm8, %v702_v39  ;;  %v1011_v47 = vpop.permute.xlu2 %1010  ;;  %vm2095_vm8 = vcmask 248960   ;;  %v1128_v39 = vpack.c.bf16 %v1118_v29, %v1116_v38 }
 0x138   : > { %693 = vst.msk [vmem:[#allocation2 + $0x8] sm:$0xf] %vm2093_vm13, %v691_v32  ;;  %vm2099_vm13 = vcmask 253060  }
 0x13c   : > { %876 = vrot.lane.b32.xlu1 %v1797_v15, %s1297_s26  ;;  %815 = vrot.lane.b32.xlu0 %v1665_v31, %s1299_s28 }
 0x13d   : > { %1096 = vrot.lane.b32.xlu2 %v1819_v55, %s1311_s14 }
 0x13e   : > { %v840_v10 = vpop.permute.xlu1 %839  ;;  %v783_v4 = vpop.permute.xlu0 %782 }
 0x13f   : > { %785 = vst.msk [vmem:[#allocation2 + $0x48] sm:$0xf] %vm2094_vm11, %v783_v4  ;;  %v832_v36 = vpop.permute.xlu2 %831  ;;  %vm2100_vm11 = vcmask 257160  }
 0x140   : > { %842 = vst.msk [vmem:[#allocation2 + $0x48] sm:$0xf] %vm2095_vm8, %v840_v10  ;;  %vm2101_vm8 = vcmask 388360  }
 0x141   : > { %899 = vst.msk [vmem:[#allocation2 + $0x48] sm:$0xf] %vm2096_vm2, %v897_v28  ;;  %vm2102_vm2 = vcmask 384260  }
 0x144   : > { %1104 = vrot.lane.b32.xlu1 %v1819_v55, %s1307_s8  ;;  %1100 = vrot.lane.b32.xlu0 %v1085_v51, %s1312_s15 }
 0x145   : > { %1108 = vrot.lane.b32.xlu2 %v1085_v51, %s1308_s9 }
 0x146   : > { %v954_v31 = vpop.permute.xlu1 %953  ;;  %v716_v41 = vpop.permute.xlu0 %715 }
 0x147   : > { %956 = vst.msk [vmem:[#allocation2 + $0x48] sm:$0xf] %vm337_vm6, %v954_v31  ;;  %v728_v52 = vpop.permute.xlu2 %727 }
 0x148   : > { %718 = vst.msk [vmem:[#allocation2 + $0x28] sm:$0xf0] %vm2097_vm3, %v716_v41  ;;  %vm2103_vm3 = vcmask 388352  }
 0x149   : > { %1013 = vst.msk [vmem:[#allocation2 + $0x48] sm:$0xf] %vm400_vm7, %v1011_v47 }
 0x14a   : > { %730 = vst.msk [vmem:[#allocation2 + $0x40] sm:$0xf] %vm2083_vm12, %v728_v52  ;;  %vm2116_vm12 = vcmask 654852  }
 0x14c   : > { %868 = vrot.lane.b32.xlu1 %v1797_v15, %s1301_s30  ;;  %857 = vrot.lane.b32.xlu0 %v1676_v37, %s1300_s29 }
 0x14d   : > { %872 = vrot.lane.b32.xlu2 %v1676_v37, %s1302_s4 }
 0x14e   : > { %v777_v53 = vpop.permute.xlu1 %776  ;;  %v773_v54 = vpop.permute.xlu0 %772 }
 0x14f   : > { %779 = vst.msk [vmem:[#allocation2 + $0x38] sm:$0xf] %vm2098_vm5, %v777_v53  ;;  %v889_v55 = vpop.permute.xlu2 %888  ;;  %vm2104_vm5 = vcmask 130060   ;;  %v1135_v53 = vld [vmem:[%s2045_s2] sm:$0xff] }
 0x150   : > { %775 = vst.msk [vmem:[#allocation2 + $0x28] sm:$0xf0] %vm2099_vm13, %v773_v54  ;;  %vm2105_vm13 = vcmask 261252  }
 0x151   : > { %834 = vst.msk [vmem:[#allocation2 + $0x38] sm:$0xf] %vm2100_vm11, %v832_v36  ;;  %v1124_v56 = vld [vmem:[#allocation2 + $0x40] sm:$0xff]  ;;  %vm2106_vm11 = vcmask 519560  }
 0x152   : > { %891 = vst.msk [vmem:[#allocation2 + $0x38] sm:$0xf] %vm2101_vm8, %v889_v55  ;;  %v1132_v57 = vpack.c.bf16 0.0, %v1124_v56  ;;  %vm2107_vm8 = vcmask 515460   ;;  %v1313_v55 = vmov 0  }
 0x153   : > { %1278 = vset.pattern.permute.xlu1 %v1313_v55  ;;  %1279 = vset.pattern.permute.xlu0 %v1313_v55 }
 0x154   : > { %914 = vrot.lane.b32.xlu1 %v1697_v46, %s1303_s5  ;;  %933 = vrot.lane.b32.xlu0 %v1835_v63, %s1300_s29 }
 0x155   : > { %1150 = vmatpush.bf16.msra.mxu0 %v1132_v57  ;;  %925 = vrot.lane.b32.xlu2 %v1835_v63, %s1304_s6 }
 0x156   : > { %v828_v37 = vpop.permute.xlu1 %827  ;;  %v824_v15 = vpop.permute.xlu0 %823 }
 0x157   : > { %830 = vst.msk [vmem:[#allocation2 + $0x28] sm:$0xf0] %vm2102_vm2, %v828_v37  ;;  %v710_v16 = vpop.permute.xlu2 %709  ;;  %vm2108_vm2 = vcmask 519552  }
 0x158   : > { %826 = vst.msk [vmem:[#allocation2 + $0x28] sm:$0xf] %vm2103_vm3, %v824_v15  ;;  %vm2109_vm3 = vcmask 392452  }
 0x159   : > { %712 = vst.msk [vmem:[#allocation2 + $0x18] sm:$0xf0] %vm2104_vm5, %v710_v16  ;;  %vm2110_vm5 = vcmask 646660  }
 0x15c   : > { %990 = vrot.lane.b32.xlu1 %v1862_v17, %s1303_s5  ;;  %929 = vrot.lane.b32.xlu0 %v1697_v46, %s1306_s7 }
 0x15d   : > { %971 = vrot.lane.b32.xlu2 %v1725_v61, %s1307_s8 }
 0x15e   : > { %v1068_v30 = vpop.permute.xlu1 %1067  ;;  %v836_v60 = vpop.permute.xlu0 %835 }
 0x15f   : > { %1070 = vst.msk [vmem:[#allocation2 + $0x48] sm:$0xf] %vm463_vm14, %v1068_v30  ;;  %v946_v62 = vpop.permute.xlu2 %945 }
 0x160   : > { %838 = vst.msk [vmem:[#allocation2 + $0x38] sm:$0xf0] %vm2105_vm13, %v836_v60  ;;  %vm2111_vm13 = vcmask 650752  }
 0x161   : > { %948 = vst.msk [vmem:[#allocation2 + $0x38] sm:$0xf] %vm2106_vm11, %v946_v62  ;;  %vm2112_vm11 = vcmask 781952  }
 0x164   : > { %986 = vrot.lane.b32.xlu1 %v1725_v61, %s1309_s10  ;;  %982 = vrot.lane.b32.xlu0 %v1862_v17, %s1308_s9 }
 0x165   : > { %1047 = vrot.lane.b32.xlu2 %v1894_v34, %s1307_s8 }
 0x166   : > { %v885_v46 = vpop.permute.xlu1 %884  ;;  %v881_v26 = vpop.permute.xlu0 %880 }
 0x167   : > { %887 = vst.msk [vmem:[#allocation2 + $0x28] sm:$0xf0] %vm2107_vm8, %v885_v46  ;;  %v995_v63 = vpop.permute.xlu2 %994  ;;  %vm2113_vm8 = vcmask 380160  }
 0x168   : > { %883 = vst.msk [vmem:[#allocation2 + $0x28] sm:$0xf] %vm2108_vm2, %v881_v26  ;;  %vm2114_vm2 = vcmask 261260  }
 0x16c   : > { %1039 = vrot.lane.b32.xlu1 %v1894_v34, %s1311_s14  ;;  %1028 = vrot.lane.b32.xlu0 %v1771_v24, %s1310_s11 }
 0x16d   : > { %1043 = vrot.lane.b32.xlu2 %v1771_v24, %s1312_s15 }
 0x16e   : > { %v1113_v61 = vpop.permute.xlu1 %1112  ;;  %v893_v35 = vpop.permute.xlu0 %892 }
 0x16f   : > { %1115 = vst.msk [vmem:[#allocation2 + $0x48] sm:$0xf] %vm526_vm15, %v1113_v61  ;;  %v1007_v0 = vpop.permute.xlu2 %1006 }
 0x170   : > { %895 = vst.msk [vmem:[#allocation2 + $0x38] sm:$0xf0] %vm2109_vm3, %v893_v35  ;;  %vm2115_vm3 = vcmask 523652  }
 0x174   : > { %1086 = vrot.lane.b32.xlu0 %v1085_v51, %s1310_s11  ;;  %v1134_v51 = vld [vmem:[%s2044_s1] sm:$0xf]  ;;  %1138 = vperm.xlu1 %1278, %v1135_v53  }
 0x176   : > { %v942_v1 = vpop.permute.xlu1 %941  ;;  %v938_v2 = vpop.permute.xlu0 %937  ;;  %v1125_v5 = vld [vmem:[#allocation2 + $0x48] sm:$0xff] }
 0x177   : > { %944 = vst.msk [vmem:[#allocation2 + $0x28] sm:$0xf0] %vm2110_vm5, %v942_v1  ;;  %v1133_v13 = vpack.c.bf16 %v1280_v9, %v1125_v5  ;;  %v761_v18 = vpop.permute.xlu2 %760  ;;  %vm2117_vm5 = vcmask 392452  }
 0x178   : > { %940 = vst.msk [vmem:[#allocation2 + $0x28] sm:$0xf] %vm2111_vm13, %v938_v2  ;;  %vm2118_vm13 = vcmask 388360  }
 0x179   : > { %997 = vst.msk [vmem:[#allocation2 + $0x28] sm:$0xf] %vm2112_vm11, %v995_v63  ;;  %1163 = vmatpush.bf16.msra.mxu1 %v1133_v13  ;;  %vm2119_vm11 = vmmov %vm2115_vm3 }
 0x17a   : > { %763 = vst.msk [vmem:[#allocation2 + $0x18] sm:$0xf] %vm2113_vm8, %v761_v18  ;;  %vm2121_vm8 = vcmask 392460  }
 0x17e   : > { %v765_v24 = vpop.permute.xlu1 %764  ;;  %v950_v44 = vpop.permute.xlu0 %949 }
 0x17f   : > { %767 = vst.msk [vmem:[#allocation2 + $0x18] sm:$0xf0] %vm2114_vm2, %v765_v24  ;;  %v1056_v14 = vpop.permute.xlu2 %1055  ;;  %vm2124_vm2 = vcmask 781960  }
 0x180   : > { %952 = vst.msk [vmem:[#allocation2 + $0x38] sm:$0xf0] %vm2115_vm3, %v950_v44  ;;  %vm2125_vm3 = vcmask 917252  }
 0x181   : > { %1009 = vst.msk [vmem:[#allocation2 + $0x38] sm:$0xf0] %vm2116_vm12, %v1007_v0  ;;  %vm2120_vm12 = vcmask 913152  }
 0x186   : > { %v1003_v33 = vpop.permute.xlu1 %1002  ;;  %v999_v45 = vpop.permute.xlu0 %998 }
 0x187   : > { %1005 = vst.msk [vmem:[#allocation2 + $0x38] sm:$0xf] %vm383_vm10, %v1003_v33  ;;  %v720_v17 = vpop.permute.xlu2 %719 }
 0x188   : > { %1001 = vst.msk [vmem:[#allocation2 + $0x28] sm:$0xf0] %vm541_vm0, %v999_v45  ;;  %vm2122_vm0 = vcmask 1044352  }
 0x189   : > { %1058 = vst.msk [vmem:[#allocation2 + $0x28] sm:$0xf0] %vm604_vm4, %v1056_v14  ;;  %vm2123_vm4 = vcmask 786052  }
 0x18a   : > { %722 = vst.msk [vmem:[#allocation2 + $0x30] sm:$0xf] %vm572_vm1, %v720_v17 }
 0x18e   : > { %v757_v48 = vpop.permute.xlu1 %756  ;;  %v746_v19 = vpop.permute.xlu0 %745 }
 0x18f   : > { %759 = vst.msk [vmem:[#allocation2 + $0x8] sm:$0xf0] %vm2117_vm5, %v757_v48  ;;  %v812_v20 = vpop.permute.xlu2 %811  ;;  %vm2126_vm5 = vcmask 519560  }
 0x190   : > { %748 = vst.msk [vmem:[#allocation2 + $0x8] sm:$0xf] %vm2118_vm13, %v746_v19  ;;  %vm2127_vm13 = vcmask 1048452  }
 0x191   : > { %814 = vst.msk [vmem:[#allocation2 + $0x8] sm:$0xf0] %vm2119_vm11, %v812_v20  ;;  %vm2128_vm11 = vcmask 523660  }
 0x196   : > { %v1052_v21 = vpop.permute.xlu1 %1051  ;;  %v820_v22 = vpop.permute.xlu0 %819 }
 0x197   : > { %1054 = vst.msk [vmem:[#allocation2 + $0x28] sm:$0xf] %vm2120_vm12, %v1052_v21  ;;  %v1097_v23 = vpop.permute.xlu2 %1096  ;;  %vm2129_vm12 = vcmask 1040260  }
 0x198   : > { %822 = vst.msk [vmem:[#allocation2 + $0x18] sm:$0xf0] %vm2121_vm8, %v820_v22  ;;  %vm2130_vm8 = vcmask 654852  }
 0x199   : > { %1099 = vst.msk [vmem:[#allocation2 + $0x28] sm:$0xf] %vm2122_vm0, %v1097_v23  ;;  %vm1141_vm0 = vcmask 392192  }
 0x19e   : > { %v1064_v25 = vpop.permute.xlu1 %1063  ;;  %v1060_v27 = vpop.permute.xlu0 %1059 }
 0x19f   : > { %1066 = vst.msk [vmem:[#allocation2 + $0x38] sm:$0xf0] %vm2123_vm4, %v1064_v25  ;;  %v1109_v8 = vpop.permute.xlu2 %1108 }
 0x1a0   : > { %1062 = vst.msk [vmem:[#allocation2 + $0x38] sm:$0xf] %vm2124_vm2, %v1060_v27 }
 0x1a1   : > { %1111 = vst.msk [vmem:[#allocation2 + $0x38] sm:$0xf0] %vm2125_vm3, %v1109_v8 }
 0x1a6   : > { %v801_v11 = vpop.permute.xlu1 %800  ;;  %v724_v58 = vpop.permute.xlu0 %723 }
 0x1a7   : > { %803 = vst.msk [vmem:[#allocation2 + $0x8] sm:$0xf] %vm2126_vm5, %v801_v11  ;;  %v873_v59 = vpop.permute.xlu2 %872  ;;  %vm2139_vm5 = vcmask 1048460  }
 0x1a8   : > { %726 = vst.msk [vmem:[#allocation2 + $0x30] sm:$0xf0] %vm2127_vm13, %v724_v58 }
 0x1ae   : > { %v877_v34 = vpop.permute.xlu1 %876  ;;  %v816_v3 = vpop.permute.xlu0 %815 }
 0x1af   : > { %879 = vst.msk [vmem:[#allocation2 + $0x18] sm:$0xf0] %vm2128_vm11, %v877_v34  ;;  %v1122_v28 = vld [vmem:[#allocation2 + $0x30] sm:$0xff]  ;;  %v926_v43 = vpop.permute.xlu2 %925 }
 0x1b0   : > { %818 = vst.msk [vmem:[#allocation2 + $0x18] sm:$0xf] %vm337_vm6, %v816_v3  ;;  %v1130_v6 = vpack.c.bf16 %v1122_v28, %v1120_v12  ;;  %vm2131_vm6 = vmmov %vm2123_vm4  ;;  %vm2133_vm4 = vcmask 654860  }
 0x1b1   : > { %875 = vst.msk [vmem:[#allocation2 + $0x18] sm:$0xf] %vm400_vm7, %v873_v59  ;;  %vm2132_vm7 = vmmov %vm2124_vm2  ;;  %vm2135_vm2 = vcmask 917260  }
 0x1b2   : > { %1151 = vmatpush.bf16.msra.mxu0 %v1130_v6 }
 0x1b6   : > { %1152 = vmatpush.bf16.msra.mxu0 %v1128_v39  ;;  %v1105_v32 = vpop.permute.xlu1 %1104  ;;  %v1101_v42 = vpop.permute.xlu0 %1100 }
 0x1b7   : > { %1107 = vst.msk [vmem:[#allocation2 + $0x38] sm:$0xf] %vm509_vm9, %v1105_v32  ;;  %v972_v4 = vpop.permute.xlu2 %971 }
 0x1b8   : > { %1103 = vst.msk [vmem:[#allocation2 + $0x28] sm:$0xf0] %vm2129_vm12, %v1101_v42 }
 0x1b9   : > { %1239 = vmatmul.msk.bf16.vlgmr.msra.gmra.mxu0 %vm1141_vm0, %v1134_v51 }
 0x1be   : > { %v869_v47 = vpop.permute.xlu1 %868  ;;  %v858_v49 = vpop.permute.xlu0 %857  ;;  %v1123_v50 = vld [vmem:[#allocation2 + $0x38] sm:$0xff] }
 0x1bf   : > { %871 = vst.msk [vmem:[#allocation2 + $0x8] sm:$0xf0] %vm2130_vm8, %v869_v47  ;;  %v1121_v7 = vld [vmem:[#allocation2 + $0x28] sm:$0xff]  ;;  %v1048_v31 = vpop.permute.xlu2 %1047 }
 0x1c0   : > { %860 = vst.msk [vmem:[#allocation2 + $0x8] sm:$0xf] %vm383_vm10, %v858_v49  ;;  %v1131_v10 = vpack.c.bf16 %v1123_v50, %v1121_v7  ;;  %vm2134_vm10 = vcmask 786060  }
 0x1c1   : > { %928 = vst.msk [vmem:[#allocation2 + $0x8] sm:$0xf0] %vm2131_vm6, %v926_v43 }
 0x1c2   : > { %1164 = vmatpush.bf16.msra.mxu1 %v1131_v10 }
 0x1c6   : > { %v915_v40 = vpop.permute.xlu1 %914  ;;  %v934_v36 = vpop.permute.xlu0 %933 }
 0x1c7   : > { %917 = vst.msk [vmem:[#allocation2 + $0x8] sm:$0xf] %vm2132_vm7, %v915_v40  ;;  %v1044_v54 = vpop.permute.xlu2 %1043 }
 0x1c8   : > { %936 = vst.msk [vmem:[#allocation2 + $0x18] sm:$0xf0] %vm2133_vm4, %v934_v36 }
 0x1c9   : > { %974 = vst.msk [vmem:[#allocation2 + $0x8] sm:$0xf] %vm509_vm9, %v972_v4  ;;  %vm2136_vm9 = vmmov %vm2125_vm3  ;;  %vm2137_vm3 = vcmask 1036160  }
 0x1ce   : > { %v991_v41 = vpop.permute.xlu1 %990  ;;  %v930_v52 = vpop.permute.xlu0 %929 }
 0x1cf   : > { %993 = vst.msk [vmem:[#allocation2 + $0x18] sm:$0xf0] %vm2134_vm10, %v991_v41 }
 0x1d0   : > { %932 = vst.msk [vmem:[#allocation2 + $0x18] sm:$0xf] %vm463_vm14, %v930_v52  ;;  %vm2138_vm14 = vmmov %vm2127_vm13 }
 0x1d1   : > { %1050 = vst.msk [vmem:[#allocation2 + $0x18] sm:$0xf0] %vm2135_vm2, %v1048_v31 }
 0x1d6   : > { %v987_v56 = vpop.permute.xlu1 %986  ;;  %v983_v57 = vpop.permute.xlu0 %982 }
 0x1d7   : > { %989 = vst.msk [vmem:[#allocation2 + $0x18] sm:$0xf] %vm526_vm15, %v987_v56 }
 0x1d8   : > { %985 = vst.msk [vmem:[#allocation2 + $0x8] sm:$0xf0] %vm2136_vm9, %v983_v57 }
 0x1d9   : > { %1046 = vst.msk [vmem:[#allocation2 + $0x18] sm:$0xf] %vm2137_vm3, %v1044_v54 }
 0x1de   : > { %v1040_v37 = vpop.permute.xlu1 %1039  ;;  %v1029_v15 = vpop.permute.xlu0 %1028 }
 0x1df   : > { %1042 = vst.msk [vmem:[#allocation2 + $0x8] sm:$0xf0] %vm2138_vm14, %v1040_v37 }
 0x1e0   : > { %1031 = vst.msk [vmem:[#allocation2 + $0x8] sm:$0xf] %vm572_vm1, %v1029_v15 }
 0x1e6   : > { %v1087_v16 = vpop.permute.xlu0 %1086  ;;  %v1139_v26 = vpop.permute.xlu1 %1138 }
 0x1e7   : > { %1089 = vst.msk [vmem:[#allocation2 + $0x18] sm:$0xf0] %vm2139_vm5, %v1087_v16  ;;  %v1117_v30 = vld [vmem:[#allocation2 + $0x8] sm:$0xff] }
 0x1ee   : > { %v1119_v60 = vld [vmem:[#allocation2 + $0x18] sm:$0xff] }
 0x1ef   : > { %v1129_v62 = vpack.c.bf16 %v1119_v60, %v1117_v30 }
 0x1f1   : > { %1165 = vmatpush.bf16.msra.mxu1 %v1129_v62 }
 0x1f4   : > { %1240 = vmatmul.msk.bf16.vlgmr.msra.gmra.mxu1 %vm1141_vm0, %v1134_v51 }
 0x236   : > { %v1154_v46 = vpop.f32.mrf.mxu0 }
 0x237   : > { %v1155_v63 = vadd.f32 %v1154_v46, %v1139_v26 }
 0x239   : > { %v1171_v61 = vmax.f32 %v1155_v63, 0.0 }
 0x23b   : > { %1173 = vst [vmem:[%s170_s23] sm:$0xff] %v1171_v61 }
 0x23e   : > { %v1156_v35 = vpop.f32.mrf.mxu0 }
 0x271   : > { %v1167_v0 = vpop.f32.mrf.mxu1 }
 0x272   : > { %v1168_v1 = vadd.f32 %v1167_v0, %v1139_v26 }
 0x274   : > { %v1172_v2 = vmax.f32 %v1168_v1, 0.0 }
 0x276   : > { %1174 = vst [vmem:[%s170_s23 + $0x8] sm:$0xff] %v1172_v2 }
 0x279   : > { %v1169_v5 = vpop.f32.mrf.mxu1 }
 0x27a PF: > { %s13_s12 = sadd.s32 1, %s1287_s12  }
 0x27b   : > { %p10_p4 = scmp.ge.s32.totalorder %s13_s12, 4  }
 0x27d   :  { %12 = sbr.rel (!%p10_p4) target bundleno = 1 (0x1), region = 62 }

</bundles_post_ra>
